<compile_context>
chip_gen: v5e
topology: v5e:2x2
jax: 0.10.0
libtpu: 0.0.40
codegen_flags: <defaults>
</compile_context>

<pallas_src>
import functools

import jax
import jax.numpy as jnp
from jax import lax
from jax.experimental import pallas as pl
from jax.experimental.pallas import tpu as pltpu


def _round_up(x, m):
    return (x + m - 1) // m * m


# ----------------------------------------------------------------------------
# Pallas kernel
# ----------------------------------------------------------------------------
def make_lstm_kernel(num_layers, input_size, hidden_size, seq_len, bg):
    L, I, H, T = num_layers, input_size, hidden_size, seq_len

    def kernel(*refs):
        # refs = [x_ref,
        #         (w_ih_T, w_hh_T, b) * L,
        #         fc_w_T, fc_b,
        #         out_ref, hn_ref, cn_ref,
        #         act_sc, gates_sc]
        x_ref = refs[0]
        idx = 1
        layer_refs = []
        for _ in range(L):
            layer_refs.append((refs[idx], refs[idx + 1], refs[idx + 2]))
            idx += 3
        fc_w_ref = refs[idx]
        fc_b_ref = refs[idx + 1]
        out_ref = refs[idx + 2]
        hn_ref = refs[idx + 3]
        cn_ref = refs[idx + 4]
        act_sc = refs[idx + 5]      # (T, bg, H)  bf16 : per-layer output slab
        gates_sc = refs[idx + 6]    # (T, bg, 4H) f32  : precomputed input proj

        # Lane mask selecting the 'g' (cell candidate) gate inside (bg, 4H).
        # Hoisted once: JAX does not CSE broadcast_in_dim.
        lane = lax.broadcasted_iota(jnp.int32, (bg, 4 * H), 1)
        g_mask = (lane >= 2 * H) & (lane < 3 * H)
        # tanh(x) = 2*sigmoid(2x) - 1  -> one EUP pass over all four gates:
        #   i/f/o lanes: sigmoid(x);   g lanes: 2*sigmoid(2x) - 1.
        gate_scale = jnp.where(g_mask, 2.0, 1.0).astype(jnp.float32)
        gate_off = jnp.where(g_mask, -1.0, 0.0).astype(jnp.float32)

        h_last = None
        c_last = None
        for l in range(L):
            w_ih_ref, w_hh_ref, b_ref = layer_refs[l]

            # ---- 1) input projection for ALL time steps: one big MXU matmul.
            if l == 0:
                inp2d = x_ref[...].reshape(T * bg, I).astype(jnp.bfloat16)
            else:
                inp2d = act_sc[...].reshape(T * bg, H)     # already bf16
            gates_pre = (
                jnp.dot(inp2d, w_ih_ref[...],
                        preferred_element_type=jnp.float32)
                + b_ref[...]                     # bias broadcast once per layer
            )                                     # (T*bg, 4H) f32
            gates_sc[...] = gates_pre.reshape(T, bg, 4 * H)

            # ---- 2) recurrence: only h_{t-1} @ W_hh on the serial path.
            w_hh = w_hh_ref[...]                  # (H, 4H) bf16, loaded once

            def step(t, carry):
                h_prev, c_prev = carry            # bf16 (bg,H), f32 (bg,H)
                g = gates_sc[t] + jnp.dot(
                    h_prev, w_hh, preferred_element_type=jnp.float32)
                # single full-width sigmoid; g-gate lanes become tanh via
                # the pre/post scale+offset above
                act = jax.nn.sigmoid(g * gate_scale) * gate_scale + gate_off
                i_g = act[:, 0 * H:1 * H]
                f_g = act[:, 1 * H:2 * H]
                g_g = act[:, 2 * H:3 * H]
                o_g = act[:, 3 * H:4 * H]
                c_new = f_g * c_prev + i_g * g_g
                h_new = (o_g * jnp.tanh(c_new)).astype(jnp.bfloat16)
                act_sc[t] = h_new                 # layer output -> next layer
                return (h_new, c_new)

            h0 = jnp.zeros((bg, H), jnp.bfloat16)
            c0 = jnp.zeros((bg, H), jnp.float32)
            h_last, c_last = lax.fori_loop(0, T, step, (h0, c0),
                                           unroll=min(T, 8))

            # write final states directly (no extra scratch copies)
            hn_ref[l] = h_last.astype(jnp.float32)
            cn_ref[l] = c_last

        # fc applied to the top layer's hidden state at the last time step
        # (== out[:, -1, :] in the PyTorch module). bf16 matmul, f32 accumulate,
        # lane-padded output -> unmasked vector stores.
        out_ref[...] = (
            jnp.dot(h_last, fc_w_ref[...], preferred_element_type=jnp.float32)
            + fc_b_ref[...]
        )

    return kernel


# ----------------------------------------------------------------------------
# Wrapper
# ----------------------------------------------------------------------------
@functools.partial(jax.jit, static_argnames=("hidden_size", "num_layers"))
def lstm_model_forward(x, params, *, hidden_size, num_layers):
    """x: (B, T, I) float32.  Returns (out (B,O), hn (L,B,H), cn (L,B,H))."""
    B, T, I = x.shape
    H, L = hidden_size, num_layers
    O = params["fc_w"].shape[0]
    O_pad = _round_up(O, 128)

    # Batch tile: largest sublane-aligned group the batch allows, capped at the
    # 128-row MXU width (portable across v5e/v6e/v7x).
    if B <= 128:
        BG = _round_up(max(B, 1), 8)
        B_pad = BG
    else:
        BG = 128
        B_pad = _round_up(B, 128)
    n_groups = B_pad // BG   # >=2 feeds the 2nd TensorCore on v7x when B > 128

    # time-major + batch padded to the tile size
    x_tm = jnp.transpose(x, (1, 0, 2)).astype(jnp.float32)        # (T, B, I)
    if B_pad != B:
        x_tm = jnp.pad(x_tm, ((0, 0), (0, B_pad - B), (0, 0)))

    vmem = pl.BlockSpec(memory_space=pltpu.MemorySpace.VMEM)
    inputs = [x_tm]
    in_specs = [pl.BlockSpec((T, BG, I), lambda b: (0, b, 0))]
    weight_bytes = 0
    for l in range(L):
        w_ih = jnp.transpose(params[f"w_ih_{l}"]).astype(jnp.bfloat16)
        w_hh = jnp.transpose(params[f"w_hh_{l}"]).astype(jnp.bfloat16)
        b = (params[f"b_ih_{l}"] + params[f"b_hh_{l}"]
             ).astype(jnp.float32).reshape(1, 4 * H)
        inputs += [w_ih, w_hh, b]
        in_specs += [vmem, vmem, vmem]
        weight_bytes += w_ih.size * 2 + w_hh.size * 2 + b.size * 4
    fc_w = jnp.transpose(params["fc_w"]).astype(jnp.bfloat16)      # (H, O)
    fc_w = jnp.pad(fc_w, ((0, 0), (0, O_pad - O)))                 # (H, O_pad)
    fc_b = jnp.pad(params["fc_b"].astype(jnp.float32),
                   (0, O_pad - O)).reshape(1, O_pad)
    inputs += [fc_w, fc_b]
    in_specs += [vmem, vmem]
    weight_bytes += fc_w.size * 2 + fc_b.size * 4

    # VMEM budget: x block (double-buffered f32) + f32 gate slab + bf16
    # activation slab + resident weights + double-buffered outputs, 2x headroom.
    est = (2 * T * BG * I * 4
           + T * BG * 4 * H * 4
           + T * BG * H * 2
           + weight_bytes
           + 2 * (BG * O_pad * 4 + 2 * L * BG * H * 4))
    vmem_limit = int(min(100 * 1024 * 1024, max(32 * 1024 * 1024, 2 * est)))

    kernel = make_lstm_kernel(L, I, H, T, BG)

    out, hn, cn = pl.pallas_call(
        kernel,
        grid=(n_groups,),
        out_shape=(
            jax.ShapeDtypeStruct((B_pad, O_pad), jnp.float32),
            jax.ShapeDtypeStruct((L, B_pad, H), jnp.float32),
            jax.ShapeDtypeStruct((L, B_pad, H), jnp.float32),
        ),
        in_specs=in_specs,
        out_specs=(
            pl.BlockSpec((BG, O_pad), lambda b: (b, 0)),
            pl.BlockSpec((L, BG, H), lambda b: (0, b, 0)),
            pl.BlockSpec((L, BG, H), lambda b: (0, b, 0)),
        ),
        scratch_shapes=[
            pltpu.VMEM((T, BG, H), jnp.bfloat16),       # layer activation slab
            pltpu.VMEM((T, BG, 4 * H), jnp.float32),    # precomputed gate slab
        ],
        compiler_params=pltpu.CompilerParams(
            dimension_semantics=("parallel",),           # 2nd TC on v7x
            vmem_limit_bytes=vmem_limit,
        ),
    )(*inputs)
    return out[:B, :O], hn[:, :B], cn[:, :B]


# ----------------------------------------------------------------------------
# Pure-JAX reference (mirrors PyTorch nn.LSTM + nn.Linear semantics)
# ----------------------------------------------------------------------------
def lstm_model_ref(x, params, hidden_size, num_layers):
    B, T, _ = x.shape
    H, L = hidden_size, num_layers
    hn = jnp.zeros((L, B, H), jnp.float32)
    cn = jnp.zeros((L, B, H), jnp.float32)
    layer_in = x
    for l in range(L):
        w_ih = params[f"w_ih_{l}"]
        w_hh = params[f"w_hh_{l}"]
        b = params[f"b_ih_{l}"] + params[f"b_hh_{l}"]
        h_l = jnp.zeros((B, H), jnp.float32)
        c_l = jnp.zeros((B, H), jnp.float32)
        hs = []
        for t in range(T):
            g = layer_in[:, t, :] @ w_ih.T + h_l @ w_hh.T + b
            i = jax.nn.sigmoid(g[:, :H])
            f = jax.nn.sigmoid(g[:, H:2 * H])
            gg = jnp.tanh(g[:, 2 * H:3 * H])
            o = jax.nn.sigmoid(g[:, 3 * H:4 * H])
            c_l = f * c_l + i * gg
            h_l = o * jnp.tanh(c_l)
            hs.append(h_l)
        layer_in = jnp.stack(hs, axis=1)
        hn = hn.at[l].set(h_l)
        cn = cn.at[l].set(c_l)
    out = layer_in[:, -1, :] @ params["fc_w"].T + params["fc_b"]
    return out, hn, cn


# ----------------------------------------------------------------------------
# Deterministic parameter init (same shapes as nn.LSTM / nn.Linear)
# ----------------------------------------------------------------------------
def init_params(key, input_size, hidden_size, num_layers, output_size):
    H = hidden_size
    params = {}
    bound = 1.0 / jnp.sqrt(H)
    for l in range(num_layers):
        in_sz = input_size if l == 0 else H
        key, k1, k2, k3, k4 = jax.random.split(key, 5)
        params[f"w_ih_{l}"] = jax.random.uniform(
            k1, (4 * H, in_sz), jnp.float32, -bound, bound)
        params[f"w_hh_{l}"] = jax.random.uniform(
            k2, (4 * H, H), jnp.float32, -bound, bound)
        params[f"b_ih_{l}"] = jax.random.uniform(
            k3, (4 * H,), jnp.float32, -bound, bound)
        params[f"b_hh_{l}"] = jax.random.uniform(
            k4, (4 * H,), jnp.float32, -bound, bound)
    key, k1, k2 = jax.random.split(key, 3)
    params["fc_w"] = jax.random.uniform(
        k1, (output_size, H), jnp.float32, -bound, bound)
    params["fc_b"] = jax.random.uniform(
        k2, (output_size,), jnp.float32, -bound, bound)
    return params


if __name__ == "__main__":
    B, T = 2, 8                 # batch, sequence length
    input_size = 16
    hidden_size = 32
    num_layers = 2
    output_size = 8

    key = jax.random.PRNGKey(0)
    key, kx = jax.random.split(key)
    x = jax.random.normal(kx, (B, T, input_size), jnp.float32)
    params = init_params(key, input_size, hidden_size, num_layers, output_size)

    out, hn, cn = lstm_model_forward(
        x, params, hidden_size=hidden_size, num_layers=num_layers)
    jax.block_until_ready((out, hn, cn))

    out_r, hn_r, cn_r = lstm_model_ref(x, params, hidden_size, num_layers)
    # bf16 matmul operands / bf16 hidden state -> bf16-appropriate tolerances.
    assert jnp.allclose(out, out_r, atol=3e-2, rtol=3e-2), "out mismatch"
    assert jnp.allclose(hn, hn_r, atol=3e-2, rtol=3e-2), "hn mismatch"
    assert jnp.allclose(cn, cn_r, atol=3e-2, rtol=3e-2), "cn mismatch"

    print("KERNEL_OK")
</pallas_src>

<mosaic_0001>
module attributes {stable_mosaic.version = 11 : i64} {
  func.func @kernel(%arg0: i32, %arg1: memref<8x8x16xf32, #tpu.memory_space<vmem>>, %arg2: memref<16x128xbf16, #tpu.memory_space<vmem>>, %arg3: memref<32x128xbf16, #tpu.memory_space<vmem>>, %arg4: memref<1x128xf32, #tpu.memory_space<vmem>>, %arg5: memref<32x128xbf16, #tpu.memory_space<vmem>>, %arg6: memref<32x128xbf16, #tpu.memory_space<vmem>>, %arg7: memref<1x128xf32, #tpu.memory_space<vmem>>, %arg8: memref<32x128xbf16, #tpu.memory_space<vmem>>, %arg9: memref<1x128xf32, #tpu.memory_space<vmem>>, %arg10: memref<8x128xf32, #tpu.memory_space<vmem>>, %arg11: memref<2x8x32xf32, #tpu.memory_space<vmem>>, %arg12: memref<2x8x32xf32, #tpu.memory_space<vmem>>, %arg13: memref<8x8x32xbf16, #tpu.memory_space<vmem>>, %arg14: memref<8x8x128xf32, #tpu.memory_space<vmem>>) attributes {dimension_semantics = [#tpu.dimension_semantics<parallel>], iteration_bounds = array<i64: 1>, scalar_prefetch = 0 : i64, scratch_operands = 2 : i64, tpu.core_type = #tpu.core_type<tc>, window_params = [{transform_indices = @transform_0, window_bounds = array<i64: 8, 8, 16>}, {pipeline_mode = #tpu.pipeline_mode<synchronous>, transform_indices = @transform_1, window_bounds = array<i64: 16, 128>}, {pipeline_mode = #tpu.pipeline_mode<synchronous>, transform_indices = @transform_2, window_bounds = array<i64: 32, 128>}, {pipeline_mode = #tpu.pipeline_mode<synchronous>, transform_indices = @transform_3, window_bounds = array<i64: 1, 128>}, {pipeline_mode = #tpu.pipeline_mode<synchronous>, transform_indices = @transform_4, window_bounds = array<i64: 32, 128>}, {pipeline_mode = #tpu.pipeline_mode<synchronous>, transform_indices = @transform_5, window_bounds = array<i64: 32, 128>}, {pipeline_mode = #tpu.pipeline_mode<synchronous>, transform_indices = @transform_6, window_bounds = array<i64: 1, 128>}, {pipeline_mode = #tpu.pipeline_mode<synchronous>, transform_indices = @transform_7, window_bounds = array<i64: 32, 128>}, {pipeline_mode = #tpu.pipeline_mode<synchronous>, transform_indices = @transform_8, window_bounds = array<i64: 1, 128>}, {transform_indices = @transform_9, window_bounds = array<i64: 8, 128>}, {transform_indices = @transform_10, window_bounds = array<i64: 2, 8, 32>}, {transform_indices = @transform_11, window_bounds = array<i64: 2, 8, 32>}]} {
    %0 = tpu.iota {dimensions = array<i32: 1>} : vector<8x128xi32>
    %c64_i32 = arith.constant 64 : i32
    %1 = vector.broadcast %c64_i32 : i32 to vector<8x128xi32>
    %2 = arith.cmpi sge, %0, %1 : vector<8x128xi32>
    %c96_i32 = arith.constant 96 : i32
    %3 = vector.broadcast %c96_i32 : i32 to vector<8x128xi32>
    %4 = arith.cmpi slt, %0, %3 : vector<8x128xi32>
    %5 = arith.andi %2, %4 : vector<8x128xi1>
    %cst = arith.constant 2.000000e+00 : f32
    %cst_0 = arith.constant 1.000000e+00 : f32
    %6 = vector.broadcast %cst : f32 to vector<8x128xf32>
    %7 = vector.broadcast %cst_0 : f32 to vector<8x128xf32>
    %8 = arith.select %5, %6, %7 : vector<8x128xi1>, vector<8x128xf32>
    %cst_1 = arith.constant -1.000000e+00 : f32
    %cst_2 = arith.constant 0.000000e+00 : f32
    %9 = vector.broadcast %cst_1 : f32 to vector<8x128xf32>
    %10 = vector.broadcast %cst_2 : f32 to vector<8x128xf32>
    %11 = arith.select %5, %9, %10 : vector<8x128xi1>, vector<8x128xf32>
    %c0 = arith.constant 0 : index
    %c0_3 = arith.constant 0 : index
    %c0_4 = arith.constant 0 : index
    %12 = vector.load %arg1[%c0, %c0_3, %c0_4] : memref<8x8x16xf32, #tpu.memory_space<vmem>>, vector<8x8x16xf32>
    %13 = vector.shape_cast %12 : vector<8x8x16xf32> to vector<64x16xf32>
    %14 = arith.truncf %13 : vector<64x16xf32> to vector<64x16xbf16>
    %c0_5 = arith.constant 0 : index
    %c0_6 = arith.constant 0 : index
    %15 = vector.load %arg2[%c0_5, %c0_6] : memref<16x128xbf16, #tpu.memory_space<vmem>>, vector<16x128xbf16>
    %cst_7 = arith.constant dense<0.000000e+00> : vector<64x128xf32>
    %16 = tpu.matmul %14, %15, %cst_7 {dimension_numbers = #tpu.dot_dimension_numbers<[1], [0], [0], [1], [0, 0, 1, 1], [], []>} : vector<64x16xbf16>, vector<16x128xbf16>, vector<64x128xf32> -> vector<64x128xf32>
    %c0_8 = arith.constant 0 : index
    %c0_9 = arith.constant 0 : index
    %17 = vector.load %arg4[%c0_8, %c0_9] : memref<1x128xf32, #tpu.memory_space<vmem>>, vector<1x128xf32>
    %18 = vector.broadcast %17 : vector<1x128xf32> to vector<64x128xf32>
    %19 = arith.addf %16, %18 : vector<64x128xf32>
    %20 = vector.shape_cast %19 : vector<64x128xf32> to vector<8x8x128xf32>
    %c0_10 = arith.constant 0 : index
    %c0_11 = arith.constant 0 : index
    %c0_12 = arith.constant 0 : index
    %21 = vector.load %arg14[%c0_10, %c0_11, %c0_12] : memref<8x8x128xf32, #tpu.memory_space<vmem>>, vector<8x8x128xf32>
    tpu.vector_store %arg14[%c0_10, %c0_11, %c0_12], %20 {strides = array<i32>} : memref<8x8x128xf32, #tpu.memory_space<vmem>>, vector<8x8x128xf32>,
    %c0_13 = arith.constant 0 : index
    %c0_14 = arith.constant 0 : index
    %22 = vector.load %arg3[%c0_13, %c0_14] : memref<32x128xbf16, #tpu.memory_space<vmem>>, vector<32x128xbf16>
    %cst_15 = arith.constant 0.000000e+00 : bf16
    %23 = vector.broadcast %cst_15 : bf16 to vector<8x32xbf16>
    %cst_16 = arith.constant 0.000000e+00 : f32
    %24 = vector.broadcast %cst_16 : f32 to vector<8x32xf32>
    %c0_i32 = arith.constant 0 : i32
    %25 = arith.index_cast %c0_i32 : i32 to index
    %c0_17 = arith.constant 0 : index
    %c0_18 = arith.constant 0 : index
    %26 = vector.load %arg14[%25, %c0_17, %c0_18] : memref<8x8x128xf32, #tpu.memory_space<vmem>>, vector<1x8x128xf32>
    %27 = vector.shape_cast %26 : vector<1x8x128xf32> to vector<8x128xf32>
    %cst_19 = arith.constant dense<0.000000e+00> : vector<8x128xf32>
    %28 = tpu.matmul %23, %22, %cst_19 {dimension_numbers = #tpu.dot_dimension_numbers<[1], [0], [0], [1], [0, 0, 1, 1], [], []>} : vector<8x32xbf16>, vector<32x128xbf16>, vector<8x128xf32> -> vector<8x128xf32>
    %29 = arith.addf %27, %28 : vector<8x128xf32>
    %30 = arith.mulf %29, %8 : vector<8x128xf32>
    %31 = arith.negf %30 : vector<8x128xf32>
    %32 = math.exp %31 : vector<8x128xf32>
    %cst_20 = arith.constant 1.000000e+00 : f32
    %33 = vector.broadcast %cst_20 : f32 to vector<8x128xf32>
    %34 = arith.addf %33, %32 : vector<8x128xf32>
    %35 = arith.divf %33, %34 : vector<8x128xf32>
    %36 = arith.mulf %35, %8 : vector<8x128xf32>
    %37 = arith.addf %36, %11 : vector<8x128xf32>
    %38 = vector.extract_strided_slice %37 {offsets = [0, 0], sizes = [8, 32], strides = [1, 1]} : vector<8x128xf32> to vector<8x32xf32>
    %39 = vector.extract_strided_slice %37 {offsets = [0, 32], sizes = [8, 32], strides = [1, 1]} : vector<8x128xf32> to vector<8x32xf32>
    %40 = vector.extract_strided_slice %37 {offsets = [0, 64], sizes = [8, 32], strides = [1, 1]} : vector<8x128xf32> to vector<8x32xf32>
    %41 = vector.extract_strided_slice %37 {offsets = [0, 96], sizes = [8, 32], strides = [1, 1]} : vector<8x128xf32> to vector<8x32xf32>
    %42 = arith.mulf %39, %24 : vector<8x32xf32>
    %43 = arith.mulf %38, %40 : vector<8x32xf32>
    %44 = arith.addf %42, %43 : vector<8x32xf32>
    %45 = math.tanh %44 : vector<8x32xf32>
    %46 = arith.mulf %41, %45 : vector<8x32xf32>
    %47 = arith.truncf %46 : vector<8x32xf32> to vector<8x32xbf16>
    %48 = arith.index_cast %c0_i32 : i32 to index
    %c0_21 = arith.constant 0 : index
    %c0_22 = arith.constant 0 : index
    %49 = vector.load %arg13[%48, %c0_21, %c0_22] : memref<8x8x32xbf16, #tpu.memory_space<vmem>>, vector<1x8x32xbf16>
    %50 = vector.shape_cast %49 : vector<1x8x32xbf16> to vector<8x32xbf16>
    %51 = vector.shape_cast %47 : vector<8x32xbf16> to vector<1x8x32xbf16>
    tpu.vector_store %arg13[%48, %c0_21, %c0_22], %51 {strides = array<i32>} : memref<8x8x32xbf16, #tpu.memory_space<vmem>>, vector<1x8x32xbf16>,
    %c1_i32 = arith.constant 1 : i32
    %52 = arith.index_cast %c1_i32 : i32 to index
    %c0_23 = arith.constant 0 : index
    %c0_24 = arith.constant 0 : index
    %53 = vector.load %arg14[%52, %c0_23, %c0_24] : memref<8x8x128xf32, #tpu.memory_space<vmem>>, vector<1x8x128xf32>
    %54 = vector.shape_cast %53 : vector<1x8x128xf32> to vector<8x128xf32>
    %cst_25 = arith.constant dense<0.000000e+00> : vector<8x128xf32>
    %55 = tpu.matmul %47, %22, %cst_25 {dimension_numbers = #tpu.dot_dimension_numbers<[1], [0], [0], [1], [0, 0, 1, 1], [], []>} : vector<8x32xbf16>, vector<32x128xbf16>, vector<8x128xf32> -> vector<8x128xf32>
    %56 = arith.addf %54, %55 : vector<8x128xf32>
    %57 = arith.mulf %56, %8 : vector<8x128xf32>
    %58 = arith.negf %57 : vector<8x128xf32>
    %59 = math.exp %58 : vector<8x128xf32>
    %cst_26 = arith.constant 1.000000e+00 : f32
    %60 = vector.broadcast %cst_26 : f32 to vector<8x128xf32>
    %61 = arith.addf %60, %59 : vector<8x128xf32>
    %62 = arith.divf %60, %61 : vector<8x128xf32>
    %63 = arith.mulf %62, %8 : vector<8x128xf32>
    %64 = arith.addf %63, %11 : vector<8x128xf32>
    %65 = vector.extract_strided_slice %64 {offsets = [0, 0], sizes = [8, 32], strides = [1, 1]} : vector<8x128xf32> to vector<8x32xf32>
    %66 = vector.extract_strided_slice %64 {offsets = [0, 32], sizes = [8, 32], strides = [1, 1]} : vector<8x128xf32> to vector<8x32xf32>
    %67 = vector.extract_strided_slice %64 {offsets = [0, 64], sizes = [8, 32], strides = [1, 1]} : vector<8x128xf32> to vector<8x32xf32>
    %68 = vector.extract_strided_slice %64 {offsets = [0, 96], sizes = [8, 32], strides = [1, 1]} : vector<8x128xf32> to vector<8x32xf32>
    %69 = arith.mulf %66, %44 : vector<8x32xf32>
    %70 = arith.mulf %65, %67 : vector<8x32xf32>
    %71 = arith.addf %69, %70 : vector<8x32xf32>
    %72 = math.tanh %71 : vector<8x32xf32>
    %73 = arith.mulf %68, %72 : vector<8x32xf32>
    %74 = arith.truncf %73 : vector<8x32xf32> to vector<8x32xbf16>
    %75 = arith.index_cast %c1_i32 : i32 to index
    %c0_27 = arith.constant 0 : index
    %c0_28 = arith.constant 0 : index
    %76 = vector.load %arg13[%75, %c0_27, %c0_28] : memref<8x8x32xbf16, #tpu.memory_space<vmem>>, vector<1x8x32xbf16>
    %77 = vector.shape_cast %76 : vector<1x8x32xbf16> to vector<8x32xbf16>
    %78 = vector.shape_cast %74 : vector<8x32xbf16> to vector<1x8x32xbf16>
    tpu.vector_store %arg13[%75, %c0_27, %c0_28], %78 {strides = array<i32>} : memref<8x8x32xbf16, #tpu.memory_space<vmem>>, vector<1x8x32xbf16>,
    %c2_i32 = arith.constant 2 : i32
    %79 = arith.index_cast %c2_i32 : i32 to index
    %c0_29 = arith.constant 0 : index
    %c0_30 = arith.constant 0 : index
    %80 = vector.load %arg14[%79, %c0_29, %c0_30] : memref<8x8x128xf32, #tpu.memory_space<vmem>>, vector<1x8x128xf32>
    %81 = vector.shape_cast %80 : vector<1x8x128xf32> to vector<8x128xf32>
    %cst_31 = arith.constant dense<0.000000e+00> : vector<8x128xf32>
    %82 = tpu.matmul %74, %22, %cst_31 {dimension_numbers = #tpu.dot_dimension_numbers<[1], [0], [0], [1], [0, 0, 1, 1], [], []>} : vector<8x32xbf16>, vector<32x128xbf16>, vector<8x128xf32> -> vector<8x128xf32>
    %83 = arith.addf %81, %82 : vector<8x128xf32>
    %84 = arith.mulf %83, %8 : vector<8x128xf32>
    %85 = arith.negf %84 : vector<8x128xf32>
    %86 = math.exp %85 : vector<8x128xf32>
    %cst_32 = arith.constant 1.000000e+00 : f32
    %87 = vector.broadcast %cst_32 : f32 to vector<8x128xf32>
    %88 = arith.addf %87, %86 : vector<8x128xf32>
    %89 = arith.divf %87, %88 : vector<8x128xf32>
    %90 = arith.mulf %89, %8 : vector<8x128xf32>
    %91 = arith.addf %90, %11 : vector<8x128xf32>
    %92 = vector.extract_strided_slice %91 {offsets = [0, 0], sizes = [8, 32], strides = [1, 1]} : vector<8x128xf32> to vector<8x32xf32>
    %93 = vector.extract_strided_slice %91 {offsets = [0, 32], sizes = [8, 32], strides = [1, 1]} : vector<8x128xf32> to vector<8x32xf32>
    %94 = vector.extract_strided_slice %91 {offsets = [0, 64], sizes = [8, 32], strides = [1, 1]} : vector<8x128xf32> to vector<8x32xf32>
    %95 = vector.extract_strided_slice %91 {offsets = [0, 96], sizes = [8, 32], strides = [1, 1]} : vector<8x128xf32> to vector<8x32xf32>
    %96 = arith.mulf %93, %71 : vector<8x32xf32>
    %97 = arith.mulf %92, %94 : vector<8x32xf32>
    %98 = arith.addf %96, %97 : vector<8x32xf32>
    %99 = math.tanh %98 : vector<8x32xf32>
    %100 = arith.mulf %95, %99 : vector<8x32xf32>
    %101 = arith.truncf %100 : vector<8x32xf32> to vector<8x32xbf16>
    %102 = arith.index_cast %c2_i32 : i32 to index
    %c0_33 = arith.constant 0 : index
    %c0_34 = arith.constant 0 : index
    %103 = vector.load %arg13[%102, %c0_33, %c0_34] : memref<8x8x32xbf16, #tpu.memory_space<vmem>>, vector<1x8x32xbf16>
    %104 = vector.shape_cast %103 : vector<1x8x32xbf16> to vector<8x32xbf16>
    %105 = vector.shape_cast %101 : vector<8x32xbf16> to vector<1x8x32xbf16>
    tpu.vector_store %arg13[%102, %c0_33, %c0_34], %105 {strides = array<i32>} : memref<8x8x32xbf16, #tpu.memory_space<vmem>>, vector<1x8x32xbf16>,
    %c3_i32 = arith.constant 3 : i32
    %106 = arith.index_cast %c3_i32 : i32 to index
    %c0_35 = arith.constant 0 : index
    %c0_36 = arith.constant 0 : index
    %107 = vector.load %arg14[%106, %c0_35, %c0_36] : memref<8x8x128xf32, #tpu.memory_space<vmem>>, vector<1x8x128xf32>
    %108 = vector.shape_cast %107 : vector<1x8x128xf32> to vector<8x128xf32>
    %cst_37 = arith.constant dense<0.000000e+00> : vector<8x128xf32>
    %109 = tpu.matmul %101, %22, %cst_37 {dimension_numbers = #tpu.dot_dimension_numbers<[1], [0], [0], [1], [0, 0, 1, 1], [], []>} : vector<8x32xbf16>, vector<32x128xbf16>, vector<8x128xf32> -> vector<8x128xf32>
    %110 = arith.addf %108, %109 : vector<8x128xf32>
    %111 = arith.mulf %110, %8 : vector<8x128xf32>
    %112 = arith.negf %111 : vector<8x128xf32>
    %113 = math.exp %112 : vector<8x128xf32>
    %cst_38 = arith.constant 1.000000e+00 : f32
    %114 = vector.broadcast %cst_38 : f32 to vector<8x128xf32>
    %115 = arith.addf %114, %113 : vector<8x128xf32>
    %116 = arith.divf %114, %115 : vector<8x128xf32>
    %117 = arith.mulf %116, %8 : vector<8x128xf32>
    %118 = arith.addf %117, %11 : vector<8x128xf32>
    %119 = vector.extract_strided_slice %118 {offsets = [0, 0], sizes = [8, 32], strides = [1, 1]} : vector<8x128xf32> to vector<8x32xf32>
    %120 = vector.extract_strided_slice %118 {offsets = [0, 32], sizes = [8, 32], strides = [1, 1]} : vector<8x128xf32> to vector<8x32xf32>
    %121 = vector.extract_strided_slice %118 {offsets = [0, 64], sizes = [8, 32], strides = [1, 1]} : vector<8x128xf32> to vector<8x32xf32>
    %122 = vector.extract_strided_slice %118 {offsets = [0, 96], sizes = [8, 32], strides = [1, 1]} : vector<8x128xf32> to vector<8x32xf32>
    %123 = arith.mulf %120, %98 : vector<8x32xf32>
    %124 = arith.mulf %119, %121 : vector<8x32xf32>
    %125 = arith.addf %123, %124 : vector<8x32xf32>
    %126 = math.tanh %125 : vector<8x32xf32>
    %127 = arith.mulf %122, %126 : vector<8x32xf32>
    %128 = arith.truncf %127 : vector<8x32xf32> to vector<8x32xbf16>
    %129 = arith.index_cast %c3_i32 : i32 to index
    %c0_39 = arith.constant 0 : index
    %c0_40 = arith.constant 0 : index
    %130 = vector.load %arg13[%129, %c0_39, %c0_40] : memref<8x8x32xbf16, #tpu.memory_space<vmem>>, vector<1x8x32xbf16>
    %131 = vector.shape_cast %130 : vector<1x8x32xbf16> to vector<8x32xbf16>
    %132 = vector.shape_cast %128 : vector<8x32xbf16> to vector<1x8x32xbf16>
    tpu.vector_store %arg13[%129, %c0_39, %c0_40], %132 {strides = array<i32>} : memref<8x8x32xbf16, #tpu.memory_space<vmem>>, vector<1x8x32xbf16>,
    %c4_i32 = arith.constant 4 : i32
    %133 = arith.index_cast %c4_i32 : i32 to index
    %c0_41 = arith.constant 0 : index
    %c0_42 = arith.constant 0 : index
    %134 = vector.load %arg14[%133, %c0_41, %c0_42] : memref<8x8x128xf32, #tpu.memory_space<vmem>>, vector<1x8x128xf32>
    %135 = vector.shape_cast %134 : vector<1x8x128xf32> to vector<8x128xf32>
    %cst_43 = arith.constant dense<0.000000e+00> : vector<8x128xf32>
    %136 = tpu.matmul %128, %22, %cst_43 {dimension_numbers = #tpu.dot_dimension_numbers<[1], [0], [0], [1], [0, 0, 1, 1], [], []>} : vector<8x32xbf16>, vector<32x128xbf16>, vector<8x128xf32> -> vector<8x128xf32>
    %137 = arith.addf %135, %136 : vector<8x128xf32>
    %138 = arith.mulf %137, %8 : vector<8x128xf32>
    %139 = arith.negf %138 : vector<8x128xf32>
    %140 = math.exp %139 : vector<8x128xf32>
    %cst_44 = arith.constant 1.000000e+00 : f32
    %141 = vector.broadcast %cst_44 : f32 to vector<8x128xf32>
    %142 = arith.addf %141, %140 : vector<8x128xf32>
    %143 = arith.divf %141, %142 : vector<8x128xf32>
    %144 = arith.mulf %143, %8 : vector<8x128xf32>
    %145 = arith.addf %144, %11 : vector<8x128xf32>
    %146 = vector.extract_strided_slice %145 {offsets = [0, 0], sizes = [8, 32], strides = [1, 1]} : vector<8x128xf32> to vector<8x32xf32>
    %147 = vector.extract_strided_slice %145 {offsets = [0, 32], sizes = [8, 32], strides = [1, 1]} : vector<8x128xf32> to vector<8x32xf32>
    %148 = vector.extract_strided_slice %145 {offsets = [0, 64], sizes = [8, 32], strides = [1, 1]} : vector<8x128xf32> to vector<8x32xf32>
    %149 = vector.extract_strided_slice %145 {offsets = [0, 96], sizes = [8, 32], strides = [1, 1]} : vector<8x128xf32> to vector<8x32xf32>
    %150 = arith.mulf %147, %125 : vector<8x32xf32>
    %151 = arith.mulf %146, %148 : vector<8x32xf32>
    %152 = arith.addf %150, %151 : vector<8x32xf32>
    %153 = math.tanh %152 : vector<8x32xf32>
    %154 = arith.mulf %149, %153 : vector<8x32xf32>
    %155 = arith.truncf %154 : vector<8x32xf32> to vector<8x32xbf16>
    %156 = arith.index_cast %c4_i32 : i32 to index
    %c0_45 = arith.constant 0 : index
    %c0_46 = arith.constant 0 : index
    %157 = vector.load %arg13[%156, %c0_45, %c0_46] : memref<8x8x32xbf16, #tpu.memory_space<vmem>>, vector<1x8x32xbf16>
    %158 = vector.shape_cast %157 : vector<1x8x32xbf16> to vector<8x32xbf16>
    %159 = vector.shape_cast %155 : vector<8x32xbf16> to vector<1x8x32xbf16>
    tpu.vector_store %arg13[%156, %c0_45, %c0_46], %159 {strides = array<i32>} : memref<8x8x32xbf16, #tpu.memory_space<vmem>>, vector<1x8x32xbf16>,
    %c5_i32 = arith.constant 5 : i32
    %160 = arith.index_cast %c5_i32 : i32 to index
    %c0_47 = arith.constant 0 : index
    %c0_48 = arith.constant 0 : index
    %161 = vector.load %arg14[%160, %c0_47, %c0_48] : memref<8x8x128xf32, #tpu.memory_space<vmem>>, vector<1x8x128xf32>
    %162 = vector.shape_cast %161 : vector<1x8x128xf32> to vector<8x128xf32>
    %cst_49 = arith.constant dense<0.000000e+00> : vector<8x128xf32>
    %163 = tpu.matmul %155, %22, %cst_49 {dimension_numbers = #tpu.dot_dimension_numbers<[1], [0], [0], [1], [0, 0, 1, 1], [], []>} : vector<8x32xbf16>, vector<32x128xbf16>, vector<8x128xf32> -> vector<8x128xf32>
    %164 = arith.addf %162, %163 : vector<8x128xf32>
    %165 = arith.mulf %164, %8 : vector<8x128xf32>
    %166 = arith.negf %165 : vector<8x128xf32>
    %167 = math.exp %166 : vector<8x128xf32>
    %cst_50 = arith.constant 1.000000e+00 : f32
    %168 = vector.broadcast %cst_50 : f32 to vector<8x128xf32>
    %169 = arith.addf %168, %167 : vector<8x128xf32>
    %170 = arith.divf %168, %169 : vector<8x128xf32>
    %171 = arith.mulf %170, %8 : vector<8x128xf32>
    %172 = arith.addf %171, %11 : vector<8x128xf32>
    %173 = vector.extract_strided_slice %172 {offsets = [0, 0], sizes = [8, 32], strides = [1, 1]} : vector<8x128xf32> to vector<8x32xf32>
    %174 = vector.extract_strided_slice %172 {offsets = [0, 32], sizes = [8, 32], strides = [1, 1]} : vector<8x128xf32> to vector<8x32xf32>
    %175 = vector.extract_strided_slice %172 {offsets = [0, 64], sizes = [8, 32], strides = [1, 1]} : vector<8x128xf32> to vector<8x32xf32>
    %176 = vector.extract_strided_slice %172 {offsets = [0, 96], sizes = [8, 32], strides = [1, 1]} : vector<8x128xf32> to vector<8x32xf32>
    %177 = arith.mulf %174, %152 : vector<8x32xf32>
    %178 = arith.mulf %173, %175 : vector<8x32xf32>
    %179 = arith.addf %177, %178 : vector<8x32xf32>
    %180 = math.tanh %179 : vector<8x32xf32>
    %181 = arith.mulf %176, %180 : vector<8x32xf32>
    %182 = arith.truncf %181 : vector<8x32xf32> to vector<8x32xbf16>
    %183 = arith.index_cast %c5_i32 : i32 to index
    %c0_51 = arith.constant 0 : index
    %c0_52 = arith.constant 0 : index
    %184 = vector.load %arg13[%183, %c0_51, %c0_52] : memref<8x8x32xbf16, #tpu.memory_space<vmem>>, vector<1x8x32xbf16>
    %185 = vector.shape_cast %184 : vector<1x8x32xbf16> to vector<8x32xbf16>
    %186 = vector.shape_cast %182 : vector<8x32xbf16> to vector<1x8x32xbf16>
    tpu.vector_store %arg13[%183, %c0_51, %c0_52], %186 {strides = array<i32>} : memref<8x8x32xbf16, #tpu.memory_space<vmem>>, vector<1x8x32xbf16>,
    %c6_i32 = arith.constant 6 : i32
    %187 = arith.index_cast %c6_i32 : i32 to index
    %c0_53 = arith.constant 0 : index
    %c0_54 = arith.constant 0 : index
    %188 = vector.load %arg14[%187, %c0_53, %c0_54] : memref<8x8x128xf32, #tpu.memory_space<vmem>>, vector<1x8x128xf32>
    %189 = vector.shape_cast %188 : vector<1x8x128xf32> to vector<8x128xf32>
    %cst_55 = arith.constant dense<0.000000e+00> : vector<8x128xf32>
    %190 = tpu.matmul %182, %22, %cst_55 {dimension_numbers = #tpu.dot_dimension_numbers<[1], [0], [0], [1], [0, 0, 1, 1], [], []>} : vector<8x32xbf16>, vector<32x128xbf16>, vector<8x128xf32> -> vector<8x128xf32>
    %191 = arith.addf %189, %190 : vector<8x128xf32>
    %192 = arith.mulf %191, %8 : vector<8x128xf32>
    %193 = arith.negf %192 : vector<8x128xf32>
    %194 = math.exp %193 : vector<8x128xf32>
    %cst_56 = arith.constant 1.000000e+00 : f32
    %195 = vector.broadcast %cst_56 : f32 to vector<8x128xf32>
    %196 = arith.addf %195, %194 : vector<8x128xf32>
    %197 = arith.divf %195, %196 : vector<8x128xf32>
    %198 = arith.mulf %197, %8 : vector<8x128xf32>
    %199 = arith.addf %198, %11 : vector<8x128xf32>
    %200 = vector.extract_strided_slice %199 {offsets = [0, 0], sizes = [8, 32], strides = [1, 1]} : vector<8x128xf32> to vector<8x32xf32>
    %201 = vector.extract_strided_slice %199 {offsets = [0, 32], sizes = [8, 32], strides = [1, 1]} : vector<8x128xf32> to vector<8x32xf32>
    %202 = vector.extract_strided_slice %199 {offsets = [0, 64], sizes = [8, 32], strides = [1, 1]} : vector<8x128xf32> to vector<8x32xf32>
    %203 = vector.extract_strided_slice %199 {offsets = [0, 96], sizes = [8, 32], strides = [1, 1]} : vector<8x128xf32> to vector<8x32xf32>
    %204 = arith.mulf %201, %179 : vector<8x32xf32>
    %205 = arith.mulf %200, %202 : vector<8x32xf32>
    %206 = arith.addf %204, %205 : vector<8x32xf32>
    %207 = math.tanh %206 : vector<8x32xf32>
    %208 = arith.mulf %203, %207 : vector<8x32xf32>
    %209 = arith.truncf %208 : vector<8x32xf32> to vector<8x32xbf16>
    %210 = arith.index_cast %c6_i32 : i32 to index
    %c0_57 = arith.constant 0 : index
    %c0_58 = arith.constant 0 : index
    %211 = vector.load %arg13[%210, %c0_57, %c0_58] : memref<8x8x32xbf16, #tpu.memory_space<vmem>>, vector<1x8x32xbf16>
    %212 = vector.shape_cast %211 : vector<1x8x32xbf16> to vector<8x32xbf16>
    %213 = vector.shape_cast %209 : vector<8x32xbf16> to vector<1x8x32xbf16>
    tpu.vector_store %arg13[%210, %c0_57, %c0_58], %213 {strides = array<i32>} : memref<8x8x32xbf16, #tpu.memory_space<vmem>>, vector<1x8x32xbf16>,
    %c7_i32 = arith.constant 7 : i32
    %214 = arith.index_cast %c7_i32 : i32 to index
    %c0_59 = arith.constant 0 : index
    %c0_60 = arith.constant 0 : index
    %215 = vector.load %arg14[%214, %c0_59, %c0_60] : memref<8x8x128xf32, #tpu.memory_space<vmem>>, vector<1x8x128xf32>
    %216 = vector.shape_cast %215 : vector<1x8x128xf32> to vector<8x128xf32>
    %cst_61 = arith.constant dense<0.000000e+00> : vector<8x128xf32>
    %217 = tpu.matmul %209, %22, %cst_61 {dimension_numbers = #tpu.dot_dimension_numbers<[1], [0], [0], [1], [0, 0, 1, 1], [], []>} : vector<8x32xbf16>, vector<32x128xbf16>, vector<8x128xf32> -> vector<8x128xf32>
    %218 = arith.addf %216, %217 : vector<8x128xf32>
    %219 = arith.mulf %218, %8 : vector<8x128xf32>
    %220 = arith.negf %219 : vector<8x128xf32>
    %221 = math.exp %220 : vector<8x128xf32>
    %cst_62 = arith.constant 1.000000e+00 : f32
    %222 = vector.broadcast %cst_62 : f32 to vector<8x128xf32>
    %223 = arith.addf %222, %221 : vector<8x128xf32>
    %224 = arith.divf %222, %223 : vector<8x128xf32>
    %225 = arith.mulf %224, %8 : vector<8x128xf32>
    %226 = arith.addf %225, %11 : vector<8x128xf32>
    %227 = vector.extract_strided_slice %226 {offsets = [0, 0], sizes = [8, 32], strides = [1, 1]} : vector<8x128xf32> to vector<8x32xf32>
    %228 = vector.extract_strided_slice %226 {offsets = [0, 32], sizes = [8, 32], strides = [1, 1]} : vector<8x128xf32> to vector<8x32xf32>
    %229 = vector.extract_strided_slice %226 {offsets = [0, 64], sizes = [8, 32], strides = [1, 1]} : vector<8x128xf32> to vector<8x32xf32>
    %230 = vector.extract_strided_slice %226 {offsets = [0, 96], sizes = [8, 32], strides = [1, 1]} : vector<8x128xf32> to vector<8x32xf32>
    %231 = arith.mulf %228, %206 : vector<8x32xf32>
    %232 = arith.mulf %227, %229 : vector<8x32xf32>
    %233 = arith.addf %231, %232 : vector<8x32xf32>
    %234 = math.tanh %233 : vector<8x32xf32>
    %235 = arith.mulf %230, %234 : vector<8x32xf32>
    %236 = arith.truncf %235 : vector<8x32xf32> to vector<8x32xbf16>
    %237 = arith.index_cast %c7_i32 : i32 to index
    %c0_63 = arith.constant 0 : index
    %c0_64 = arith.constant 0 : index
    %238 = vector.load %arg13[%237, %c0_63, %c0_64] : memref<8x8x32xbf16, #tpu.memory_space<vmem>>, vector<1x8x32xbf16>
    %239 = vector.shape_cast %238 : vector<1x8x32xbf16> to vector<8x32xbf16>
    %240 = vector.shape_cast %236 : vector<8x32xbf16> to vector<1x8x32xbf16>
    tpu.vector_store %arg13[%237, %c0_63, %c0_64], %240 {strides = array<i32>} : memref<8x8x32xbf16, #tpu.memory_space<vmem>>, vector<1x8x32xbf16>,
    %c8_i32 = arith.constant 8 : i32
    %241 = arith.extf %236 : vector<8x32xbf16> to vector<8x32xf32>
    %c0_65 = arith.constant 0 : index
    %c0_66 = arith.constant 0 : index
    %c0_67 = arith.constant 0 : index
    %242 = vector.load %arg11[%c0_65, %c0_66, %c0_67] : memref<2x8x32xf32, #tpu.memory_space<vmem>>, vector<1x8x32xf32>
    %243 = vector.shape_cast %242 : vector<1x8x32xf32> to vector<8x32xf32>
    %244 = vector.shape_cast %241 : vector<8x32xf32> to vector<1x8x32xf32>
    tpu.vector_store %arg11[%c0_65, %c0_66, %c0_67], %244 {strides = array<i32>} : memref<2x8x32xf32, #tpu.memory_space<vmem>>, vector<1x8x32xf32>,
    %c0_68 = arith.constant 0 : index
    %c0_69 = arith.constant 0 : index
    %c0_70 = arith.constant 0 : index
    %245 = vector.load %arg12[%c0_68, %c0_69, %c0_70] : memref<2x8x32xf32, #tpu.memory_space<vmem>>, vector<1x8x32xf32>
    %246 = vector.shape_cast %245 : vector<1x8x32xf32> to vector<8x32xf32>
    %247 = vector.shape_cast %233 : vector<8x32xf32> to vector<1x8x32xf32>
    tpu.vector_store %arg12[%c0_68, %c0_69, %c0_70], %247 {strides = array<i32>} : memref<2x8x32xf32, #tpu.memory_space<vmem>>, vector<1x8x32xf32>,
    %c0_71 = arith.constant 0 : index
    %c0_72 = arith.constant 0 : index
    %c0_73 = arith.constant 0 : index
    %248 = vector.load %arg13[%c0_71, %c0_72, %c0_73] : memref<8x8x32xbf16, #tpu.memory_space<vmem>>, vector<8x8x32xbf16>
    %249 = vector.shape_cast %248 : vector<8x8x32xbf16> to vector<64x32xbf16>
    %c0_74 = arith.constant 0 : index
    %c0_75 = arith.constant 0 : index
    %250 = vector.load %arg5[%c0_74, %c0_75] : memref<32x128xbf16, #tpu.memory_space<vmem>>, vector<32x128xbf16>
    %cst_76 = arith.constant dense<0.000000e+00> : vector<64x128xf32>
    %251 = tpu.matmul %249, %250, %cst_76 {dimension_numbers = #tpu.dot_dimension_numbers<[1], [0], [0], [1], [0, 0, 1, 1], [], []>} : vector<64x32xbf16>, vector<32x128xbf16>, vector<64x128xf32> -> vector<64x128xf32>
    %c0_77 = arith.constant 0 : index
    %c0_78 = arith.constant 0 : index
    %252 = vector.load %arg7[%c0_77, %c0_78] : memref<1x128xf32, #tpu.memory_space<vmem>>, vector<1x128xf32>
    %253 = vector.broadcast %252 : vector<1x128xf32> to vector<64x128xf32>
    %254 = arith.addf %251, %253 : vector<64x128xf32>
    %255 = vector.shape_cast %254 : vector<64x128xf32> to vector<8x8x128xf32>
    %c0_79 = arith.constant 0 : index
    %c0_80 = arith.constant 0 : index
    %c0_81 = arith.constant 0 : index
    %256 = vector.load %arg14[%c0_79, %c0_80, %c0_81] : memref<8x8x128xf32, #tpu.memory_space<vmem>>, vector<8x8x128xf32>
    tpu.vector_store %arg14[%c0_79, %c0_80, %c0_81], %255 {strides = array<i32>} : memref<8x8x128xf32, #tpu.memory_space<vmem>>, vector<8x8x128xf32>,
    %c0_82 = arith.constant 0 : index
    %c0_83 = arith.constant 0 : index
    %257 = vector.load %arg6[%c0_82, %c0_83] : memref<32x128xbf16, #tpu.memory_space<vmem>>, vector<32x128xbf16>
    %cst_84 = arith.constant 0.000000e+00 : bf16
    %258 = vector.broadcast %cst_84 : bf16 to vector<8x32xbf16>
    %cst_85 = arith.constant 0.000000e+00 : f32
    %259 = vector.broadcast %cst_85 : f32 to vector<8x32xf32>
    %c0_i32_86 = arith.constant 0 : i32
    %260 = arith.index_cast %c0_i32_86 : i32 to index
    %c0_87 = arith.constant 0 : index
    %c0_88 = arith.constant 0 : index
    %261 = vector.load %arg14[%260, %c0_87, %c0_88] : memref<8x8x128xf32, #tpu.memory_space<vmem>>, vector<1x8x128xf32>
    %262 = vector.shape_cast %261 : vector<1x8x128xf32> to vector<8x128xf32>
    %cst_89 = arith.constant dense<0.000000e+00> : vector<8x128xf32>
    %263 = tpu.matmul %258, %257, %cst_89 {dimension_numbers = #tpu.dot_dimension_numbers<[1], [0], [0], [1], [0, 0, 1, 1], [], []>} : vector<8x32xbf16>, vector<32x128xbf16>, vector<8x128xf32> -> vector<8x128xf32>
    %264 = arith.addf %262, %263 : vector<8x128xf32>
    %265 = arith.mulf %264, %8 : vector<8x128xf32>
    %266 = arith.negf %265 : vector<8x128xf32>
    %267 = math.exp %266 : vector<8x128xf32>
    %cst_90 = arith.constant 1.000000e+00 : f32
    %268 = vector.broadcast %cst_90 : f32 to vector<8x128xf32>
    %269 = arith.addf %268, %267 : vector<8x128xf32>
    %270 = arith.divf %268, %269 : vector<8x128xf32>
    %271 = arith.mulf %270, %8 : vector<8x128xf32>
    %272 = arith.addf %271, %11 : vector<8x128xf32>
    %273 = vector.extract_strided_slice %272 {offsets = [0, 0], sizes = [8, 32], strides = [1, 1]} : vector<8x128xf32> to vector<8x32xf32>
    %274 = vector.extract_strided_slice %272 {offsets = [0, 32], sizes = [8, 32], strides = [1, 1]} : vector<8x128xf32> to vector<8x32xf32>
    %275 = vector.extract_strided_slice %272 {offsets = [0, 64], sizes = [8, 32], strides = [1, 1]} : vector<8x128xf32> to vector<8x32xf32>
    %276 = vector.extract_strided_slice %272 {offsets = [0, 96], sizes = [8, 32], strides = [1, 1]} : vector<8x128xf32> to vector<8x32xf32>
    %277 = arith.mulf %274, %259 : vector<8x32xf32>
    %278 = arith.mulf %273, %275 : vector<8x32xf32>
    %279 = arith.addf %277, %278 : vector<8x32xf32>
    %280 = math.tanh %279 : vector<8x32xf32>
    %281 = arith.mulf %276, %280 : vector<8x32xf32>
    %282 = arith.truncf %281 : vector<8x32xf32> to vector<8x32xbf16>
    %283 = arith.index_cast %c0_i32_86 : i32 to index
    %c0_91 = arith.constant 0 : index
    %c0_92 = arith.constant 0 : index
    %284 = vector.load %arg13[%283, %c0_91, %c0_92] : memref<8x8x32xbf16, #tpu.memory_space<vmem>>, vector<1x8x32xbf16>
    %285 = vector.shape_cast %284 : vector<1x8x32xbf16> to vector<8x32xbf16>
    %286 = vector.shape_cast %282 : vector<8x32xbf16> to vector<1x8x32xbf16>
    tpu.vector_store %arg13[%283, %c0_91, %c0_92], %286 {strides = array<i32>} : memref<8x8x32xbf16, #tpu.memory_space<vmem>>, vector<1x8x32xbf16>,
    %c1_i32_93 = arith.constant 1 : i32
    %287 = arith.index_cast %c1_i32_93 : i32 to index
    %c0_94 = arith.constant 0 : index
    %c0_95 = arith.constant 0 : index
    %288 = vector.load %arg14[%287, %c0_94, %c0_95] : memref<8x8x128xf32, #tpu.memory_space<vmem>>, vector<1x8x128xf32>
    %289 = vector.shape_cast %288 : vector<1x8x128xf32> to vector<8x128xf32>
    %cst_96 = arith.constant dense<0.000000e+00> : vector<8x128xf32>
    %290 = tpu.matmul %282, %257, %cst_96 {dimension_numbers = #tpu.dot_dimension_numbers<[1], [0], [0], [1], [0, 0, 1, 1], [], []>} : vector<8x32xbf16>, vector<32x128xbf16>, vector<8x128xf32> -> vector<8x128xf32>
    %291 = arith.addf %289, %290 : vector<8x128xf32>
    %292 = arith.mulf %291, %8 : vector<8x128xf32>
    %293 = arith.negf %292 : vector<8x128xf32>
    %294 = math.exp %293 : vector<8x128xf32>
    %cst_97 = arith.constant 1.000000e+00 : f32
    %295 = vector.broadcast %cst_97 : f32 to vector<8x128xf32>
    %296 = arith.addf %295, %294 : vector<8x128xf32>
    %297 = arith.divf %295, %296 : vector<8x128xf32>
    %298 = arith.mulf %297, %8 : vector<8x128xf32>
    %299 = arith.addf %298, %11 : vector<8x128xf32>
    %300 = vector.extract_strided_slice %299 {offsets = [0, 0], sizes = [8, 32], strides = [1, 1]} : vector<8x128xf32> to vector<8x32xf32>
    %301 = vector.extract_strided_slice %299 {offsets = [0, 32], sizes = [8, 32], strides = [1, 1]} : vector<8x128xf32> to vector<8x32xf32>
    %302 = vector.extract_strided_slice %299 {offsets = [0, 64], sizes = [8, 32], strides = [1, 1]} : vector<8x128xf32> to vector<8x32xf32>
    %303 = vector.extract_strided_slice %299 {offsets = [0, 96], sizes = [8, 32], strides = [1, 1]} : vector<8x128xf32> to vector<8x32xf32>
    %304 = arith.mulf %301, %279 : vector<8x32xf32>
    %305 = arith.mulf %300, %302 : vector<8x32xf32>
    %306 = arith.addf %304, %305 : vector<8x32xf32>
    %307 = math.tanh %306 : vector<8x32xf32>
    %308 = arith.mulf %303, %307 : vector<8x32xf32>
    %309 = arith.truncf %308 : vector<8x32xf32> to vector<8x32xbf16>
    %310 = arith.index_cast %c1_i32_93 : i32 to index
    %c0_98 = arith.constant 0 : index
    %c0_99 = arith.constant 0 : index
    %311 = vector.load %arg13[%310, %c0_98, %c0_99] : memref<8x8x32xbf16, #tpu.memory_space<vmem>>, vector<1x8x32xbf16>
    %312 = vector.shape_cast %311 : vector<1x8x32xbf16> to vector<8x32xbf16>
    %313 = vector.shape_cast %309 : vector<8x32xbf16> to vector<1x8x32xbf16>
    tpu.vector_store %arg13[%310, %c0_98, %c0_99], %313 {strides = array<i32>} : memref<8x8x32xbf16, #tpu.memory_space<vmem>>, vector<1x8x32xbf16>,
    %c2_i32_100 = arith.constant 2 : i32
    %314 = arith.index_cast %c2_i32_100 : i32 to index
    %c0_101 = arith.constant 0 : index
    %c0_102 = arith.constant 0 : index
    %315 = vector.load %arg14[%314, %c0_101, %c0_102] : memref<8x8x128xf32, #tpu.memory_space<vmem>>, vector<1x8x128xf32>
    %316 = vector.shape_cast %315 : vector<1x8x128xf32> to vector<8x128xf32>
    %cst_103 = arith.constant dense<0.000000e+00> : vector<8x128xf32>
    %317 = tpu.matmul %309, %257, %cst_103 {dimension_numbers = #tpu.dot_dimension_numbers<[1], [0], [0], [1], [0, 0, 1, 1], [], []>} : vector<8x32xbf16>, vector<32x128xbf16>, vector<8x128xf32> -> vector<8x128xf32>
    %318 = arith.addf %316, %317 : vector<8x128xf32>
    %319 = arith.mulf %318, %8 : vector<8x128xf32>
    %320 = arith.negf %319 : vector<8x128xf32>
    %321 = math.exp %320 : vector<8x128xf32>
    %cst_104 = arith.constant 1.000000e+00 : f32
    %322 = vector.broadcast %cst_104 : f32 to vector<8x128xf32>
    %323 = arith.addf %322, %321 : vector<8x128xf32>
    %324 = arith.divf %322, %323 : vector<8x128xf32>
    %325 = arith.mulf %324, %8 : vector<8x128xf32>
    %326 = arith.addf %325, %11 : vector<8x128xf32>
    %327 = vector.extract_strided_slice %326 {offsets = [0, 0], sizes = [8, 32], strides = [1, 1]} : vector<8x128xf32> to vector<8x32xf32>
    %328 = vector.extract_strided_slice %326 {offsets = [0, 32], sizes = [8, 32], strides = [1, 1]} : vector<8x128xf32> to vector<8x32xf32>
    %329 = vector.extract_strided_slice %326 {offsets = [0, 64], sizes = [8, 32], strides = [1, 1]} : vector<8x128xf32> to vector<8x32xf32>
    %330 = vector.extract_strided_slice %326 {offsets = [0, 96], sizes = [8, 32], strides = [1, 1]} : vector<8x128xf32> to vector<8x32xf32>
    %331 = arith.mulf %328, %306 : vector<8x32xf32>
    %332 = arith.mulf %327, %329 : vector<8x32xf32>
    %333 = arith.addf %331, %332 : vector<8x32xf32>
    %334 = math.tanh %333 : vector<8x32xf32>
    %335 = arith.mulf %330, %334 : vector<8x32xf32>
    %336 = arith.truncf %335 : vector<8x32xf32> to vector<8x32xbf16>
    %337 = arith.index_cast %c2_i32_100 : i32 to index
    %c0_105 = arith.constant 0 : index
    %c0_106 = arith.constant 0 : index
    %338 = vector.load %arg13[%337, %c0_105, %c0_106] : memref<8x8x32xbf16, #tpu.memory_space<vmem>>, vector<1x8x32xbf16>
    %339 = vector.shape_cast %338 : vector<1x8x32xbf16> to vector<8x32xbf16>
    %340 = vector.shape_cast %336 : vector<8x32xbf16> to vector<1x8x32xbf16>
    tpu.vector_store %arg13[%337, %c0_105, %c0_106], %340 {strides = array<i32>} : memref<8x8x32xbf16, #tpu.memory_space<vmem>>, vector<1x8x32xbf16>,
    %c3_i32_107 = arith.constant 3 : i32
    %341 = arith.index_cast %c3_i32_107 : i32 to index
    %c0_108 = arith.constant 0 : index
    %c0_109 = arith.constant 0 : index
    %342 = vector.load %arg14[%341, %c0_108, %c0_109] : memref<8x8x128xf32, #tpu.memory_space<vmem>>, vector<1x8x128xf32>
    %343 = vector.shape_cast %342 : vector<1x8x128xf32> to vector<8x128xf32>
    %cst_110 = arith.constant dense<0.000000e+00> : vector<8x128xf32>
    %344 = tpu.matmul %336, %257, %cst_110 {dimension_numbers = #tpu.dot_dimension_numbers<[1], [0], [0], [1], [0, 0, 1, 1], [], []>} : vector<8x32xbf16>, vector<32x128xbf16>, vector<8x128xf32> -> vector<8x128xf32>
    %345 = arith.addf %343, %344 : vector<8x128xf32>
    %346 = arith.mulf %345, %8 : vector<8x128xf32>
    %347 = arith.negf %346 : vector<8x128xf32>
    %348 = math.exp %347 : vector<8x128xf32>
    %cst_111 = arith.constant 1.000000e+00 : f32
    %349 = vector.broadcast %cst_111 : f32 to vector<8x128xf32>
    %350 = arith.addf %349, %348 : vector<8x128xf32>
    %351 = arith.divf %349, %350 : vector<8x128xf32>
    %352 = arith.mulf %351, %8 : vector<8x128xf32>
    %353 = arith.addf %352, %11 : vector<8x128xf32>
    %354 = vector.extract_strided_slice %353 {offsets = [0, 0], sizes = [8, 32], strides = [1, 1]} : vector<8x128xf32> to vector<8x32xf32>
    %355 = vector.extract_strided_slice %353 {offsets = [0, 32], sizes = [8, 32], strides = [1, 1]} : vector<8x128xf32> to vector<8x32xf32>
    %356 = vector.extract_strided_slice %353 {offsets = [0, 64], sizes = [8, 32], strides = [1, 1]} : vector<8x128xf32> to vector<8x32xf32>
    %357 = vector.extract_strided_slice %353 {offsets = [0, 96], sizes = [8, 32], strides = [1, 1]} : vector<8x128xf32> to vector<8x32xf32>
    %358 = arith.mulf %355, %333 : vector<8x32xf32>
    %359 = arith.mulf %354, %356 : vector<8x32xf32>
    %360 = arith.addf %358, %359 : vector<8x32xf32>
    %361 = math.tanh %360 : vector<8x32xf32>
    %362 = arith.mulf %357, %361 : vector<8x32xf32>
    %363 = arith.truncf %362 : vector<8x32xf32> to vector<8x32xbf16>
    %364 = arith.index_cast %c3_i32_107 : i32 to index
    %c0_112 = arith.constant 0 : index
    %c0_113 = arith.constant 0 : index
    %365 = vector.load %arg13[%364, %c0_112, %c0_113] : memref<8x8x32xbf16, #tpu.memory_space<vmem>>, vector<1x8x32xbf16>
    %366 = vector.shape_cast %365 : vector<1x8x32xbf16> to vector<8x32xbf16>
    %367 = vector.shape_cast %363 : vector<8x32xbf16> to vector<1x8x32xbf16>
    tpu.vector_store %arg13[%364, %c0_112, %c0_113], %367 {strides = array<i32>} : memref<8x8x32xbf16, #tpu.memory_space<vmem>>, vector<1x8x32xbf16>,
    %c4_i32_114 = arith.constant 4 : i32
    %368 = arith.index_cast %c4_i32_114 : i32 to index
    %c0_115 = arith.constant 0 : index
    %c0_116 = arith.constant 0 : index
    %369 = vector.load %arg14[%368, %c0_115, %c0_116] : memref<8x8x128xf32, #tpu.memory_space<vmem>>, vector<1x8x128xf32>
    %370 = vector.shape_cast %369 : vector<1x8x128xf32> to vector<8x128xf32>
    %cst_117 = arith.constant dense<0.000000e+00> : vector<8x128xf32>
    %371 = tpu.matmul %363, %257, %cst_117 {dimension_numbers = #tpu.dot_dimension_numbers<[1], [0], [0], [1], [0, 0, 1, 1], [], []>} : vector<8x32xbf16>, vector<32x128xbf16>, vector<8x128xf32> -> vector<8x128xf32>
    %372 = arith.addf %370, %371 : vector<8x128xf32>
    %373 = arith.mulf %372, %8 : vector<8x128xf32>
    %374 = arith.negf %373 : vector<8x128xf32>
    %375 = math.exp %374 : vector<8x128xf32>
    %cst_118 = arith.constant 1.000000e+00 : f32
    %376 = vector.broadcast %cst_118 : f32 to vector<8x128xf32>
    %377 = arith.addf %376, %375 : vector<8x128xf32>
    %378 = arith.divf %376, %377 : vector<8x128xf32>
    %379 = arith.mulf %378, %8 : vector<8x128xf32>
    %380 = arith.addf %379, %11 : vector<8x128xf32>
    %381 = vector.extract_strided_slice %380 {offsets = [0, 0], sizes = [8, 32], strides = [1, 1]} : vector<8x128xf32> to vector<8x32xf32>
    %382 = vector.extract_strided_slice %380 {offsets = [0, 32], sizes = [8, 32], strides = [1, 1]} : vector<8x128xf32> to vector<8x32xf32>
    %383 = vector.extract_strided_slice %380 {offsets = [0, 64], sizes = [8, 32], strides = [1, 1]} : vector<8x128xf32> to vector<8x32xf32>
    %384 = vector.extract_strided_slice %380 {offsets = [0, 96], sizes = [8, 32], strides = [1, 1]} : vector<8x128xf32> to vector<8x32xf32>
    %385 = arith.mulf %382, %360 : vector<8x32xf32>
    %386 = arith.mulf %381, %383 : vector<8x32xf32>
    %387 = arith.addf %385, %386 : vector<8x32xf32>
    %388 = math.tanh %387 : vector<8x32xf32>
    %389 = arith.mulf %384, %388 : vector<8x32xf32>
    %390 = arith.truncf %389 : vector<8x32xf32> to vector<8x32xbf16>
    %391 = arith.index_cast %c4_i32_114 : i32 to index
    %c0_119 = arith.constant 0 : index
    %c0_120 = arith.constant 0 : index
    %392 = vector.load %arg13[%391, %c0_119, %c0_120] : memref<8x8x32xbf16, #tpu.memory_space<vmem>>, vector<1x8x32xbf16>
    %393 = vector.shape_cast %392 : vector<1x8x32xbf16> to vector<8x32xbf16>
    %394 = vector.shape_cast %390 : vector<8x32xbf16> to vector<1x8x32xbf16>
    tpu.vector_store %arg13[%391, %c0_119, %c0_120], %394 {strides = array<i32>} : memref<8x8x32xbf16, #tpu.memory_space<vmem>>, vector<1x8x32xbf16>,
    %c5_i32_121 = arith.constant 5 : i32
    %395 = arith.index_cast %c5_i32_121 : i32 to index
    %c0_122 = arith.constant 0 : index
    %c0_123 = arith.constant 0 : index
    %396 = vector.load %arg14[%395, %c0_122, %c0_123] : memref<8x8x128xf32, #tpu.memory_space<vmem>>, vector<1x8x128xf32>
    %397 = vector.shape_cast %396 : vector<1x8x128xf32> to vector<8x128xf32>
    %cst_124 = arith.constant dense<0.000000e+00> : vector<8x128xf32>
    %398 = tpu.matmul %390, %257, %cst_124 {dimension_numbers = #tpu.dot_dimension_numbers<[1], [0], [0], [1], [0, 0, 1, 1], [], []>} : vector<8x32xbf16>, vector<32x128xbf16>, vector<8x128xf32> -> vector<8x128xf32>
    %399 = arith.addf %397, %398 : vector<8x128xf32>
    %400 = arith.mulf %399, %8 : vector<8x128xf32>
    %401 = arith.negf %400 : vector<8x128xf32>
    %402 = math.exp %401 : vector<8x128xf32>
    %cst_125 = arith.constant 1.000000e+00 : f32
    %403 = vector.broadcast %cst_125 : f32 to vector<8x128xf32>
    %404 = arith.addf %403, %402 : vector<8x128xf32>
    %405 = arith.divf %403, %404 : vector<8x128xf32>
    %406 = arith.mulf %405, %8 : vector<8x128xf32>
    %407 = arith.addf %406, %11 : vector<8x128xf32>
    %408 = vector.extract_strided_slice %407 {offsets = [0, 0], sizes = [8, 32], strides = [1, 1]} : vector<8x128xf32> to vector<8x32xf32>
    %409 = vector.extract_strided_slice %407 {offsets = [0, 32], sizes = [8, 32], strides = [1, 1]} : vector<8x128xf32> to vector<8x32xf32>
    %410 = vector.extract_strided_slice %407 {offsets = [0, 64], sizes = [8, 32], strides = [1, 1]} : vector<8x128xf32> to vector<8x32xf32>
    %411 = vector.extract_strided_slice %407 {offsets = [0, 96], sizes = [8, 32], strides = [1, 1]} : vector<8x128xf32> to vector<8x32xf32>
    %412 = arith.mulf %409, %387 : vector<8x32xf32>
    %413 = arith.mulf %408, %410 : vector<8x32xf32>
    %414 = arith.addf %412, %413 : vector<8x32xf32>
    %415 = math.tanh %414 : vector<8x32xf32>
    %416 = arith.mulf %411, %415 : vector<8x32xf32>
    %417 = arith.truncf %416 : vector<8x32xf32> to vector<8x32xbf16>
    %418 = arith.index_cast %c5_i32_121 : i32 to index
    %c0_126 = arith.constant 0 : index
    %c0_127 = arith.constant 0 : index
    %419 = vector.load %arg13[%418, %c0_126, %c0_127] : memref<8x8x32xbf16, #tpu.memory_space<vmem>>, vector<1x8x32xbf16>
    %420 = vector.shape_cast %419 : vector<1x8x32xbf16> to vector<8x32xbf16>
    %421 = vector.shape_cast %417 : vector<8x32xbf16> to vector<1x8x32xbf16>
    tpu.vector_store %arg13[%418, %c0_126, %c0_127], %421 {strides = array<i32>} : memref<8x8x32xbf16, #tpu.memory_space<vmem>>, vector<1x8x32xbf16>,
    %c6_i32_128 = arith.constant 6 : i32
    %422 = arith.index_cast %c6_i32_128 : i32 to index
    %c0_129 = arith.constant 0 : index
    %c0_130 = arith.constant 0 : index
    %423 = vector.load %arg14[%422, %c0_129, %c0_130] : memref<8x8x128xf32, #tpu.memory_space<vmem>>, vector<1x8x128xf32>
    %424 = vector.shape_cast %423 : vector<1x8x128xf32> to vector<8x128xf32>
    %cst_131 = arith.constant dense<0.000000e+00> : vector<8x128xf32>
    %425 = tpu.matmul %417, %257, %cst_131 {dimension_numbers = #tpu.dot_dimension_numbers<[1], [0], [0], [1], [0, 0, 1, 1], [], []>} : vector<8x32xbf16>, vector<32x128xbf16>, vector<8x128xf32> -> vector<8x128xf32>
    %426 = arith.addf %424, %425 : vector<8x128xf32>
    %427 = arith.mulf %426, %8 : vector<8x128xf32>
    %428 = arith.negf %427 : vector<8x128xf32>
    %429 = math.exp %428 : vector<8x128xf32>
    %cst_132 = arith.constant 1.000000e+00 : f32
    %430 = vector.broadcast %cst_132 : f32 to vector<8x128xf32>
    %431 = arith.addf %430, %429 : vector<8x128xf32>
    %432 = arith.divf %430, %431 : vector<8x128xf32>
    %433 = arith.mulf %432, %8 : vector<8x128xf32>
    %434 = arith.addf %433, %11 : vector<8x128xf32>
    %435 = vector.extract_strided_slice %434 {offsets = [0, 0], sizes = [8, 32], strides = [1, 1]} : vector<8x128xf32> to vector<8x32xf32>
    %436 = vector.extract_strided_slice %434 {offsets = [0, 32], sizes = [8, 32], strides = [1, 1]} : vector<8x128xf32> to vector<8x32xf32>
    %437 = vector.extract_strided_slice %434 {offsets = [0, 64], sizes = [8, 32], strides = [1, 1]} : vector<8x128xf32> to vector<8x32xf32>
    %438 = vector.extract_strided_slice %434 {offsets = [0, 96], sizes = [8, 32], strides = [1, 1]} : vector<8x128xf32> to vector<8x32xf32>
    %439 = arith.mulf %436, %414 : vector<8x32xf32>
    %440 = arith.mulf %435, %437 : vector<8x32xf32>
    %441 = arith.addf %439, %440 : vector<8x32xf32>
    %442 = math.tanh %441 : vector<8x32xf32>
    %443 = arith.mulf %438, %442 : vector<8x32xf32>
    %444 = arith.truncf %443 : vector<8x32xf32> to vector<8x32xbf16>
    %445 = arith.index_cast %c6_i32_128 : i32 to index
    %c0_133 = arith.constant 0 : index
    %c0_134 = arith.constant 0 : index
    %446 = vector.load %arg13[%445, %c0_133, %c0_134] : memref<8x8x32xbf16, #tpu.memory_space<vmem>>, vector<1x8x32xbf16>
    %447 = vector.shape_cast %446 : vector<1x8x32xbf16> to vector<8x32xbf16>
    %448 = vector.shape_cast %444 : vector<8x32xbf16> to vector<1x8x32xbf16>
    tpu.vector_store %arg13[%445, %c0_133, %c0_134], %448 {strides = array<i32>} : memref<8x8x32xbf16, #tpu.memory_space<vmem>>, vector<1x8x32xbf16>,
    %c7_i32_135 = arith.constant 7 : i32
    %449 = arith.index_cast %c7_i32_135 : i32 to index
    %c0_136 = arith.constant 0 : index
    %c0_137 = arith.constant 0 : index
    %450 = vector.load %arg14[%449, %c0_136, %c0_137] : memref<8x8x128xf32, #tpu.memory_space<vmem>>, vector<1x8x128xf32>
    %451 = vector.shape_cast %450 : vector<1x8x128xf32> to vector<8x128xf32>
    %cst_138 = arith.constant dense<0.000000e+00> : vector<8x128xf32>
    %452 = tpu.matmul %444, %257, %cst_138 {dimension_numbers = #tpu.dot_dimension_numbers<[1], [0], [0], [1], [0, 0, 1, 1], [], []>} : vector<8x32xbf16>, vector<32x128xbf16>, vector<8x128xf32> -> vector<8x128xf32>
    %453 = arith.addf %451, %452 : vector<8x128xf32>
    %454 = arith.mulf %453, %8 : vector<8x128xf32>
    %455 = arith.negf %454 : vector<8x128xf32>
    %456 = math.exp %455 : vector<8x128xf32>
    %cst_139 = arith.constant 1.000000e+00 : f32
    %457 = vector.broadcast %cst_139 : f32 to vector<8x128xf32>
    %458 = arith.addf %457, %456 : vector<8x128xf32>
    %459 = arith.divf %457, %458 : vector<8x128xf32>
    %460 = arith.mulf %459, %8 : vector<8x128xf32>
    %461 = arith.addf %460, %11 : vector<8x128xf32>
    %462 = vector.extract_strided_slice %461 {offsets = [0, 0], sizes = [8, 32], strides = [1, 1]} : vector<8x128xf32> to vector<8x32xf32>
    %463 = vector.extract_strided_slice %461 {offsets = [0, 32], sizes = [8, 32], strides = [1, 1]} : vector<8x128xf32> to vector<8x32xf32>
    %464 = vector.extract_strided_slice %461 {offsets = [0, 64], sizes = [8, 32], strides = [1, 1]} : vector<8x128xf32> to vector<8x32xf32>
    %465 = vector.extract_strided_slice %461 {offsets = [0, 96], sizes = [8, 32], strides = [1, 1]} : vector<8x128xf32> to vector<8x32xf32>
    %466 = arith.mulf %463, %441 : vector<8x32xf32>
    %467 = arith.mulf %462, %464 : vector<8x32xf32>
    %468 = arith.addf %466, %467 : vector<8x32xf32>
    %469 = math.tanh %468 : vector<8x32xf32>
    %470 = arith.mulf %465, %469 : vector<8x32xf32>
    %471 = arith.truncf %470 : vector<8x32xf32> to vector<8x32xbf16>
    %472 = arith.index_cast %c7_i32_135 : i32 to index
    %c0_140 = arith.constant 0 : index
    %c0_141 = arith.constant 0 : index
    %473 = vector.load %arg13[%472, %c0_140, %c0_141] : memref<8x8x32xbf16, #tpu.memory_space<vmem>>, vector<1x8x32xbf16>
    %474 = vector.shape_cast %473 : vector<1x8x32xbf16> to vector<8x32xbf16>
    %475 = vector.shape_cast %471 : vector<8x32xbf16> to vector<1x8x32xbf16>
    tpu.vector_store %arg13[%472, %c0_140, %c0_141], %475 {strides = array<i32>} : memref<8x8x32xbf16, #tpu.memory_space<vmem>>, vector<1x8x32xbf16>,
    %c8_i32_142 = arith.constant 8 : i32
    %476 = arith.extf %471 : vector<8x32xbf16> to vector<8x32xf32>
    %c1 = arith.constant 1 : index
    %c0_143 = arith.constant 0 : index
    %c0_144 = arith.constant 0 : index
    %477 = vector.load %arg11[%c1, %c0_143, %c0_144] : memref<2x8x32xf32, #tpu.memory_space<vmem>>, vector<1x8x32xf32>
    %478 = vector.shape_cast %477 : vector<1x8x32xf32> to vector<8x32xf32>
    %479 = vector.shape_cast %476 : vector<8x32xf32> to vector<1x8x32xf32>
    tpu.vector_store %arg11[%c1, %c0_143, %c0_144], %479 {strides = array<i32>} : memref<2x8x32xf32, #tpu.memory_space<vmem>>, vector<1x8x32xf32>,
    %c1_145 = arith.constant 1 : index
    %c0_146 = arith.constant 0 : index
    %c0_147 = arith.constant 0 : index
    %480 = vector.load %arg12[%c1_145, %c0_146, %c0_147] : memref<2x8x32xf32, #tpu.memory_space<vmem>>, vector<1x8x32xf32>
    %481 = vector.shape_cast %480 : vector<1x8x32xf32> to vector<8x32xf32>
    %482 = vector.shape_cast %468 : vector<8x32xf32> to vector<1x8x32xf32>
    tpu.vector_store %arg12[%c1_145, %c0_146, %c0_147], %482 {strides = array<i32>} : memref<2x8x32xf32, #tpu.memory_space<vmem>>, vector<1x8x32xf32>,
    %c0_148 = arith.constant 0 : index
    %c0_149 = arith.constant 0 : index
    %483 = vector.load %arg8[%c0_148, %c0_149] : memref<32x128xbf16, #tpu.memory_space<vmem>>, vector<32x128xbf16>
    %cst_150 = arith.constant dense<0.000000e+00> : vector<8x128xf32>
    %484 = tpu.matmul %471, %483, %cst_150 {dimension_numbers = #tpu.dot_dimension_numbers<[1], [0], [0], [1], [0, 0, 1, 1], [], []>} : vector<8x32xbf16>, vector<32x128xbf16>, vector<8x128xf32> -> vector<8x128xf32>
    %c0_151 = arith.constant 0 : index
    %c0_152 = arith.constant 0 : index
    %485 = vector.load %arg9[%c0_151, %c0_152] : memref<1x128xf32, #tpu.memory_space<vmem>>, vector<1x128xf32>
    %486 = vector.broadcast %485 : vector<1x128xf32> to vector<8x128xf32>
    %487 = arith.addf %484, %486 : vector<8x128xf32>
    %c0_153 = arith.constant 0 : index
    %c0_154 = arith.constant 0 : index
    %488 = vector.load %arg10[%c0_153, %c0_154] : memref<8x128xf32, #tpu.memory_space<vmem>>, vector<8x128xf32>
    tpu.vector_store %arg10[%c0_153, %c0_154], %487 {strides = array<i32>} : memref<8x128xf32, #tpu.memory_space<vmem>>, vector<8x128xf32>,
    return
  }
  func.func @transform_0(%arg0: i32) -> (i32, i32, i32) {
    %c0_i32 = arith.constant 0 : i32
    %c0_i32_0 = arith.constant 0 : i32
    %c0_i32_1 = arith.constant 0 : i32
    return %c0_i32, %arg0, %c0_i32_0 : i32, i32, i32
  }
  func.func @transform_1(%arg0: i32) -> (i32, i32) {
    %c0_i32 = arith.constant 0 : i32
    %c0_i32_0 = arith.constant 0 : i32
    %c0_i32_1 = arith.constant 0 : i32
    return %c0_i32, %c0_i32_0 : i32, i32
  }
  func.func @transform_2(%arg0: i32) -> (i32, i32) {
    %c0_i32 = arith.constant 0 : i32
    %c0_i32_0 = arith.constant 0 : i32
    %c0_i32_1 = arith.constant 0 : i32
    return %c0_i32, %c0_i32_0 : i32, i32
  }
  func.func @transform_3(%arg0: i32) -> (i32, i32) {
    %c0_i32 = arith.constant 0 : i32
    %c0_i32_0 = arith.constant 0 : i32
    %c0_i32_1 = arith.constant 0 : i32
    return %c0_i32, %c0_i32_0 : i32, i32
  }
  func.func @transform_4(%arg0: i32) -> (i32, i32) {
    %c0_i32 = arith.constant 0 : i32
    %c0_i32_0 = arith.constant 0 : i32
    %c0_i32_1 = arith.constant 0 : i32
    return %c0_i32, %c0_i32_0 : i32, i32
  }
  func.func @transform_5(%arg0: i32) -> (i32, i32) {
    %c0_i32 = arith.constant 0 : i32
    %c0_i32_0 = arith.constant 0 : i32
    %c0_i32_1 = arith.constant 0 : i32
    return %c0_i32, %c0_i32_0 : i32, i32
  }
  func.func @transform_6(%arg0: i32) -> (i32, i32) {
    %c0_i32 = arith.constant 0 : i32
    %c0_i32_0 = arith.constant 0 : i32
    %c0_i32_1 = arith.constant 0 : i32
    return %c0_i32, %c0_i32_0 : i32, i32
  }
  func.func @transform_7(%arg0: i32) -> (i32, i32) {
    %c0_i32 = arith.constant 0 : i32
    %c0_i32_0 = arith.constant 0 : i32
    %c0_i32_1 = arith.constant 0 : i32
    return %c0_i32, %c0_i32_0 : i32, i32
  }
  func.func @transform_8(%arg0: i32) -> (i32, i32) {
    %c0_i32 = arith.constant 0 : i32
    %c0_i32_0 = arith.constant 0 : i32
    %c0_i32_1 = arith.constant 0 : i32
    return %c0_i32, %c0_i32_0 : i32, i32
  }
  func.func @transform_9(%arg0: i32) -> (i32, i32) {
    %c0_i32 = arith.constant 0 : i32
    %c0_i32_0 = arith.constant 0 : i32
    return %arg0, %c0_i32 : i32, i32
  }
  func.func @transform_10(%arg0: i32) -> (i32, i32, i32) {
    %c0_i32 = arith.constant 0 : i32
    %c0_i32_0 = arith.constant 0 : i32
    %c0_i32_1 = arith.constant 0 : i32
    return %c0_i32, %arg0, %c0_i32_0 : i32, i32, i32
  }
  func.func @transform_11(%arg0: i32) -> (i32, i32, i32) {
    %c0_i32 = arith.constant 0 : i32
    %c0_i32_0 = arith.constant 0 : i32
    %c0_i32_1 = arith.constant 0 : i32
    return %c0_i32, %arg0, %c0_i32_0 : i32, i32, i32
  }
}

</mosaic_0001>

<bundles_post_ra>
// kernel: lstm_model_forward.1
= control target key start
LH: loop header
LB: loop body
LE: loop exit
PB: predicated region body
PF: predicated region fallthrough
CT: control target
= control target key end

     0   :  { %vm67_vm0 = vcmask 130048   ;;  %v1617_v6 = vmov 0   ;;  %v36_v7 = vlaneseq  ;;  %v1618_v13 = vmov 1.0   ;;  %s1620_s27 = smov 64   ;;  %s1621_s28 = smov 32   ;;  %s2088_s1 = inlined_call_operand.vmem [shape: bf16[16,128], index: 1, kind: input, shape index: {}]   ;;  %s2089_s2 = inlined_call_operand.vmem [shape: bf16[32,128], index: 2, kind: input, shape index: {}]   ;;  %s2090_s0 = inlined_call_operand.vmem [shape: f32[8,8,16], index: 0, kind: input, shape index: {}]   ;;  %s2091_s3 = inlined_call_operand.vmem [shape: f32[1,128], index: 3, kind: input, shape index: {}]   ;;  %s2092_s4 = inlined_call_operand.vmem [shape: bf16[32,128], index: 4, kind: input, shape index: {}]   ;;  %s2093_s6 = inlined_call_operand.vmem [shape: f32[1,128], index: 6, kind: input, shape index: {}]   ;;  %s2094_s5 = inlined_call_operand.vmem [shape: bf16[32,128], index: 5, kind: input, shape index: {}]   ;;  %s2095_s11 = inlined_call_operand.vmem [shape: f32[2,8,32], index: 11, kind: output, shape index: {2}]   ;;  %s2096_s8 = inlined_call_operand.vmem [shape: f32[1,128], index: 8, kind: input, shape index: {}]   ;;  %s2097_s7 = inlined_call_operand.vmem [shape: bf16[32,128], index: 7, kind: input, shape index: {}]   ;;  %s2098_s10 = inlined_call_operand.vmem [shape: f32[2,8,32], index: 10, kind: output, shape index: {1}]   ;;  %s2099_s9 = inlined_call_operand.vmem [shape: f32[8,128], index: 9, kind: output, shape index: {0}]  }
   0x1   :  { %v1493_v0 = vld [vmem:[%s2088_s1] sm:$0xff]  ;;  %v1689_v1 = vld [vmem:[%s2089_s2 + $0x8] sm:$0xff]  ;;  %v1619_v31 = vmov 0.0   ;;  %vm134_vm8 = vcmask 261120  }
   0x2   :  { %v43_v2 = vld [vmem:[%s2090_s0] sm:$0xff]  ;;  %v44_v3 = vld [vmem:[%s2090_s0 + $0x8] sm:$0xff]  ;;  %87 = vmatpush.bf16.msra.mxu0 %v1493_v0  ;;  %144 = vmatpush.bf16.msra.mxu1 %v1689_v1  ;;  %v37_v8 = vand.u32 127, %v36_v7 }
   0x3   :  { %v51_v4 = vpack.c.bf16 %v44_v3, %v43_v2  ;;  %v1701_v5 = vld [vmem:[%s2089_s2] sm:$0xff]  ;;  %213 = vmatpush.bf16.msra.mxu2 %v1689_v1  ;;  %282 = vmatpush.bf16.msra.mxu3 %v1689_v1 }
   0x4   :  { %v1721_v9 = vld [vmem:[%s2091_s3] ss:$0 sm:$0xff]  ;;  %vm38_vm1 = vcmp.ge.s32.totalorder %v37_v8, 64  ;;  %vm39_vm2 = vcmp.lt.s32.totalorder %v37_v8, 96 }
   0x5   :  { %1404 = vmatmul.msk.bf16.vlgmr.msra.gmra.mxu0 %vm67_vm0, %v51_v4  ;;  %vm1724_vm3 = vmand %vm38_vm1, %vm39_vm2 }
   0x6   :  { %145 = vmatpush.bf16.msra.mxu1 %v1701_v5  ;;  %v1730_v14 = vsel %vm1724_vm3, 2.0, %v1618_v13  ;;  %v1735_v32 = vsel %vm1724_vm3, -1.0, %v1619_v31  ;;  %v45_v13 = vld [vmem:[%s2090_s0 + $0x10] sm:$0xff] }
   0x7   :  { %214 = vmatpush.bf16.msra.mxu2 %v1701_v5  ;;  %283 = vmatpush.bf16.msra.mxu3 %v1701_v5 }
   0x9   :  { %146 = vmatmul.bf16.vlgmr.msra.gmra.mxu1 %v1617_v6 }
   0xa   :  { %351 = vmatpush.bf16.msrb.mxu1 %v1689_v1 }
   0xb   :  { %420 = vmatpush.bf16.msrb.mxu2 %v1689_v1  ;;  %489 = vmatpush.bf16.msrb.mxu3 %v1689_v1 }
   0xe   :  { %352 = vmatpush.bf16.msrb.mxu1 %v1701_v5 }
   0xf   :  { %421 = vmatpush.bf16.msrb.mxu2 %v1701_v5  ;;  %490 = vmatpush.bf16.msrb.mxu3 %v1701_v5 }
  0x12   :  { %558 = vmatpush.bf16.msra.mxu1 %v1689_v1 }
  0x16   :  { %559 = vmatpush.bf16.msra.mxu1 %v1701_v5 }
  0x82   :  { %v89_v10 = vpop.f32.mrf.mxu0 }
  0x83   :  { %v90_v11 = vadd.f32 %v1721_v9, %v89_v10 }
  0x86   :  { %v147_v15 = vpop.f32.mrf.mxu1 }
  0x87   :  { %v151_v16 = vadd.f32 %v147_v15, %v90_v11  ;;  %v46_v15 = vld [vmem:[%s2090_s0 + $0x18] sm:$0xff] }
  0x89   :  { %v152_v17 = vmul.f32 %v151_v16, %v1730_v14  ;;  %v52_v16 = vpack.c.bf16 %v46_v15, %v45_v13 }
  0x8a   :  { %v91_v48 = vpop.f32.mrf.mxu0 }
  0x8b   :  { %v1416_v18 = vmul.f32 -1.442695, %v152_v17  ;;  %v92_v49 = vadd.f32 %v1721_v9, %v91_v48  ;;  %1405 = vmatmul.msk.bf16.gmra.mxu0 %vm67_vm0, %v52_v16 }
  0x8d   :  { %1520 = vpow2.f32 %v1416_v18 }
  0x8e   :  { %v149_v19 = vpop.f32.mrf.mxu1 }
  0x93   :  { %v1521_v20 = vpop.eup %1520 }
  0x94   :  { %v156_v21 = vadd.f32 1.0, %v1521_v20 }
  0x96   :  { %1522 = vrcp.f32 %v156_v21  ;;  %v168_v25 = vand.u32 2147483648, %v156_v21  ;;  %v166_v27 = vand.u32 2147483647, %v156_v21  ;;  %vm162_vm5 = vweird.f32 %v156_v21 }
  0x98   :  { %v169_v29 = vor.u32 1.1754944e-38, %v168_v25  ;;  %vm167_vm7 = vcmp.eq.f32.partialorder %v166_v27, 8.507059e+37 }
  0x9c   :  { %v1523_v22 = vpop.eup %1522 }
  0x9d   :  { %v158_v23 = vmul.f32 %v1523_v22, %v156_v21  ;;  %vm163_vm4 = vweird.f32 %v1523_v22 }
  0x9e   :  { %vm164_vm6 = vmor %vm162_vm5, %vm163_vm4 }
  0x9f   :  { %v159_v24 = vsub.f32 1.0, %v158_v23 }
  0xa1   :  { %v160_v26 = vmul.f32 %v1523_v22, %v159_v24 }
  0xa3   :  { %v161_v28 = vadd.f32 %v1523_v22, %v160_v26 }
  0xa5   :  { %v165_v30 = vsel %vm164_vm6, %v1523_v22, %v161_v28 }
  0xa6   :  { %v170_v33 = vsel %vm167_vm7, %v169_v29, %v165_v30 }
  0xa7   :  { %v172_v34 = vmul.f32 %v170_v33, %v1730_v14 }
  0xa9   :  { %v173_v35 = vadd.f32 %v172_v34, %v1735_v32 }
  0xab   :  { %176 = vrot.lane.b32.xlu0 %v173_v35, %s1620_s27  ;;  %v174_v38 = vmul.f32 0.0, %v173_v35 }
 0x108   :  { %v94_v23 = vpop.f32.mrf.mxu0 }
 0x109   :  { %v95_v24 = vadd.f32 %v1721_v9, %v94_v23 }
 0x11d   :  { %v177_v36 = vpop.permute.xlu0 %176 }
 0x11e   :  { %v179_v37 = vmul.f32 %v177_v36, %v173_v35 }
 0x120   :  { %181 = vrot.lane.b32.xlu0 %v179_v37, %s1621_s28 }
 0x192   :  { %v182_v39 = vpop.permute.xlu0 %181 }
 0x193   :  { %v184_v40 = vadd.f32 %v182_v39, %v174_v38 }
 0x195   :  { %1524 = vtanh.f32 %v184_v40 }
 0x19b   :  { %v1525_v41 = vpop.eup %1524 }
 0x19c   :  { %187 = vrot.lane.b32.xlu1 %v1525_v41, %s1620_s27 }
 0x20e   :  { %v188_v42 = vpop.permute.xlu1 %187 }
 0x20f   :  { %v190_v43 = vmul.f32 %v188_v42, %v173_v35 }
 0x211   :  { %v1742_v44 = vpack.c.bf16 %v190_v43, %v190_v43 }
 0x213   :  { %v200_v45 = vunpack.c.l.b16 %v1742_v44 }
 0x215   :  { %v201_v46 = vpack.c.b16 %v200_v45, %v200_v45 }
 0x217   :  { %202 = vrot.lane.b32.xlu1 %v201_v46, %s1621_s28 }
 0x289   :  { %v203_v47 = vpop.permute.xlu1 %202 }
 0x28a   :  { %1417 = vmatmul.msk.bf16.vlgmr.msra.gmra.mxu2 %vm134_vm8, %v203_v47 }
 0x28b   :  { %627 = vmatpush.bf16.msra.mxu2 %v1689_v1 }
 0x28f   :  { %628 = vmatpush.bf16.msra.mxu2 %v1701_v5 }
 0x30d   :  { %v216_v50 = vpop.f32.mrf.mxu2 }
 0x30e   :  { %v220_v51 = vadd.f32 %v216_v50, %v92_v49 }
 0x310   :  { %v221_v52 = vmul.f32 %v220_v51, %v1730_v14 }
 0x312   :  { %v1418_v53 = vmul.f32 -1.442695, %v221_v52 }
 0x314   :  { %1526 = vpow2.f32 %v1418_v53 }
 0x315   :  { %v218_v54 = vpop.f32.mrf.mxu2 }
 0x31a   :  { %v1527_v55 = vpop.eup %1526 }
 0x31b   :  { %v225_v56 = vadd.f32 1.0, %v1527_v55 }
 0x31d   :  { %1528 = vrcp.f32 %v225_v56  ;;  %v237_v60 = vand.u32 2147483648, %v225_v56  ;;  %v235_v62 = vand.u32 2147483647, %v225_v56  ;;  %vm231_vm10 = vweird.f32 %v225_v56 }
 0x31f   :  { %v238_v0 = vor.u32 1.1754944e-38, %v237_v60  ;;  %vm236_vm12 = vcmp.eq.f32.partialorder %v235_v62, 8.507059e+37 }
 0x323   :  { %v1529_v57 = vpop.eup %1528 }
 0x324   :  { %v227_v58 = vmul.f32 %v1529_v57, %v225_v56  ;;  %vm232_vm9 = vweird.f32 %v1529_v57 }
 0x325   :  { %vm233_vm11 = vmor %vm231_vm10, %vm232_vm9 }
 0x326   :  { %v228_v59 = vsub.f32 1.0, %v227_v58  ;;  %v96_v58 = vpop.f32.mrf.mxu0 }
 0x328   :  { %v229_v61 = vmul.f32 %v1529_v57, %v228_v59  ;;  %v97_v59 = vadd.f32 %v1721_v9, %v96_v58 }
 0x32a   :  { %v230_v63 = vadd.f32 %v1529_v57, %v229_v61 }
 0x32c   :  { %v234_v1 = vsel %vm233_vm11, %v1529_v57, %v230_v63 }
 0x32d   :  { %v239_v2 = vsel %vm236_vm12, %v238_v0, %v234_v1 }
 0x32e   :  { %v241_v3 = vmul.f32 %v239_v2, %v1730_v14 }
 0x330   :  { %v242_v4 = vadd.f32 %v241_v3, %v1735_v32 }
 0x332   :  { %245 = vrot.lane.b32.xlu2 %v242_v4, %s1620_s27  ;;  %v243_v8 = vmul.f32 %v242_v4, %v184_v40 }
 0x38c   :  { %v246_v5 = vpop.permute.xlu2 %245 }
 0x38d   :  { %v248_v7 = vmul.f32 %v246_v5, %v242_v4 }
 0x38f   :  { %250 = vrot.lane.b32.xlu2 %v248_v7, %s1621_s28 }
 0x3e9   :  { %v251_v10 = vpop.permute.xlu2 %250 }
 0x3ea   :  { %v253_v11 = vadd.f32 %v251_v10, %v243_v8 }
 0x3ec   :  { %1530 = vtanh.f32 %v253_v11 }
 0x3f2   :  { %v1531_v12 = vpop.eup %1530 }
 0x3f3   :  { %256 = vrot.lane.b32.xlu0 %v1531_v12, %s1620_s27 }
 0x465   :  { %v257_v17 = vpop.permute.xlu0 %256 }
 0x466   :  { %v259_v18 = vmul.f32 %v257_v17, %v242_v4 }
 0x468   :  { %v1763_v19 = vpack.c.bf16 %v259_v18, %v259_v18 }
 0x46a   :  { %v269_v20 = vunpack.c.l.b16 %v1763_v19 }
 0x46c   :  { %v270_v21 = vpack.c.b16 %v269_v20, %v269_v20 }
 0x46e   :  { %271 = vrot.lane.b32.xlu1 %v270_v21, %s1621_s28 }
 0x4e0   :  { %v272_v22 = vpop.permute.xlu1 %271 }
 0x4e1   :  { %1419 = vmatmul.msk.bf16.vlgmr.msra.gmra.mxu3 %vm134_vm8, %v272_v22 }
 0x564   :  { %v285_v25 = vpop.f32.mrf.mxu3 }
 0x565   :  { %v289_v26 = vadd.f32 %v285_v25, %v95_v24  ;;  %v47_v25 = vld [vmem:[%s2090_s0 + $0x20] sm:$0xff] }
 0x567   :  { %v290_v27 = vmul.f32 %v289_v26, %v1730_v14  ;;  %v48_v26 = vld [vmem:[%s2090_s0 + $0x28] sm:$0xff] }
 0x569   :  { %v1420_v28 = vmul.f32 -1.442695, %v290_v27  ;;  %v53_v27 = vpack.c.bf16 %v48_v26, %v47_v25 }
 0x56b   :  { %1532 = vpow2.f32 %v1420_v28  ;;  %1406 = vmatmul.msk.bf16.gmra.mxu0 %vm67_vm0, %v53_v27 }
 0x56c   :  { %v287_v29 = vpop.f32.mrf.mxu3 }
 0x571   :  { %v1533_v30 = vpop.eup %1532 }
 0x572   :  { %v294_v31 = vadd.f32 1.0, %v1533_v30 }
 0x574   :  { %1534 = vrcp.f32 %v294_v31  ;;  %v306_v36 = vand.u32 2147483648, %v294_v31  ;;  %v304_v38 = vand.u32 2147483647, %v294_v31  ;;  %vm300_vm14 = vweird.f32 %v294_v31 }
 0x576   :  { %v307_v40 = vor.u32 1.1754944e-38, %v306_v36  ;;  %vm305_vm1 = vcmp.eq.f32.partialorder %v304_v38, 8.507059e+37 }
 0x57a   :  { %v1535_v33 = vpop.eup %1534 }
 0x57b   :  { %v296_v34 = vmul.f32 %v1535_v33, %v294_v31  ;;  %vm301_vm13 = vweird.f32 %v1535_v33 }
 0x57c   :  { %vm302_vm15 = vmor %vm300_vm14, %vm301_vm13 }
 0x57d   :  { %v297_v35 = vsub.f32 1.0, %v296_v34 }
 0x57f   :  { %v298_v37 = vmul.f32 %v1535_v33, %v297_v35 }
 0x581   :  { %v299_v39 = vadd.f32 %v1535_v33, %v298_v37 }
 0x583   :  { %v303_v41 = vsel %vm302_vm15, %v1535_v33, %v299_v39  ;;  %vm196_vm15 = vcmask 257024  }
 0x584   :  { %v308_v42 = vsel %vm305_vm1, %v307_v40, %v303_v41 }
 0x585   :  { %v310_v43 = vmul.f32 %v308_v42, %v1730_v14 }
 0x587   :  { %v311_v45 = vadd.f32 %v310_v43, %v1735_v32 }
 0x589   :  { %314 = vrot.lane.b32.xlu2 %v311_v45, %s1620_s27  ;;  %v312_v48 = vmul.f32 %v311_v45, %v253_v11 }
 0x5e3   :  { %v315_v46 = vpop.permute.xlu2 %314 }
 0x5e4   :  { %v317_v47 = vmul.f32 %v315_v46, %v311_v45 }
 0x5e6   :  { %319 = vrot.lane.b32.xlu0 %v317_v47, %s1621_s28 }
 0x5e8   :  { %v99_v35 = vpop.f32.mrf.mxu0 }
 0x5e9   :  { %v100_v36 = vadd.f32 %v1721_v9, %v99_v35 }
 0x658   :  { %v320_v49 = vpop.permute.xlu0 %319 }
 0x659   :  { %v322_v50 = vadd.f32 %v320_v49, %v312_v48 }
 0x65b   :  { %1536 = vtanh.f32 %v322_v50 }
 0x661   :  { %v1537_v51 = vpop.eup %1536 }
 0x662   :  { %325 = vrot.lane.b32.xlu1 %v1537_v51, %s1620_s27 }
 0x6d4   :  { %v326_v52 = vpop.permute.xlu1 %325 }
 0x6d5   :  { %v328_v53 = vmul.f32 %v326_v52, %v311_v45 }
 0x6d7   :  { %v1775_v54 = vpack.c.bf16 %v328_v53, %v328_v53 }
 0x6d9   :  { %v338_v55 = vunpack.c.l.b16 %v1775_v54 }
 0x6db   :  { %v339_v56 = vpack.c.b16 %v338_v55, %v338_v55 }
 0x6dd   :  { %340 = vrot.lane.b32.xlu2 %v339_v56, %s1621_s28 }
 0x737   :  { %v341_v57 = vpop.permute.xlu2 %340 }
 0x738   :  { %1421 = vmatmul.msk.bf16.vlgmr.msrb.gmra.mxu1 %vm134_vm8, %v341_v57 }
 0x7b5   :  { %v354_v60 = vpop.f32.mrf.mxu1 }
 0x7b6   :  { %v358_v61 = vadd.f32 %v354_v60, %v97_v59 }
 0x7b8   :  { %v359_v62 = vmul.f32 %v358_v61, %v1730_v14 }
 0x7ba   :  { %v1422_v63 = vmul.f32 -1.442695, %v359_v62 }
 0x7bc   :  { %1538 = vpow2.f32 %v1422_v63 }
 0x7bd   :  { %v356_v0 = vpop.f32.mrf.mxu1 }
 0x7c2   :  { %v1539_v1 = vpop.eup %1538 }
 0x7c3   :  { %v363_v2 = vadd.f32 1.0, %v1539_v1 }
 0x7c5   :  { %1540 = vrcp.f32 %v363_v2  ;;  %v375_v7 = vand.u32 2147483648, %v363_v2  ;;  %v373_v10 = vand.u32 2147483647, %v363_v2  ;;  %vm369_vm3 = vweird.f32 %v363_v2 }
 0x7c7   :  { %v376_v12 = vor.u32 1.1754944e-38, %v375_v7  ;;  %vm374_vm5 = vcmp.eq.f32.partialorder %v373_v10, 8.507059e+37  ;;  %v101_v7 = vpop.f32.mrf.mxu0 }
 0x7cb   :  { %v1541_v3 = vpop.eup %1540 }
 0x7cc   :  { %v365_v4 = vmul.f32 %v1541_v3, %v363_v2  ;;  %vm370_vm2 = vweird.f32 %v1541_v3 }
 0x7cd   :  { %vm371_vm4 = vmor %vm369_vm3, %vm370_vm2 }
 0x7ce   :  { %v366_v5 = vsub.f32 1.0, %v365_v4 }
 0x7d0   :  { %v367_v8 = vmul.f32 %v1541_v3, %v366_v5 }
 0x7d2   :  { %v368_v11 = vadd.f32 %v1541_v3, %v367_v8  ;;  %v102_v8 = vadd.f32 %v1721_v9, %v101_v7 }
 0x7d4   :  { %v372_v13 = vsel %vm371_vm4, %v1541_v3, %v368_v11 }
 0x7d5   :  { %v377_v15 = vsel %vm374_vm5, %v376_v12, %v372_v13 }
 0x7d6   :  { %v379_v16 = vmul.f32 %v377_v15, %v1730_v14 }
 0x7d8   :  { %v380_v17 = vadd.f32 %v379_v16, %v1735_v32 }
 0x7da   :  { %383 = vrot.lane.b32.xlu0 %v380_v17, %s1620_s27  ;;  %v381_v21 = vmul.f32 %v380_v17, %v322_v50 }
 0x84c   :  { %v384_v18 = vpop.permute.xlu0 %383 }
 0x84d   :  { %v386_v20 = vmul.f32 %v384_v18, %v380_v17 }
 0x84f   :  { %388 = vrot.lane.b32.xlu1 %v386_v20, %s1621_s28 }
 0x8c1   :  { %v389_v22 = vpop.permute.xlu1 %388 }
 0x8c2   :  { %v391_v23 = vadd.f32 %v389_v22, %v381_v21 }
 0x8c4   :  { %1542 = vtanh.f32 %v391_v23 }
 0x8ca   :  { %v1543_v24 = vpop.eup %1542 }
 0x8cb   :  { %394 = vrot.lane.b32.xlu2 %v1543_v24, %s1620_s27 }
 0x925   :  { %v395_v28 = vpop.permute.xlu2 %394 }
 0x926   :  { %v397_v29 = vmul.f32 %v395_v28, %v380_v17 }
 0x928   :  { %v1794_v30 = vpack.c.bf16 %v397_v29, %v397_v29 }
 0x92a   :  { %v407_v31 = vunpack.c.l.b16 %v1794_v30 }
 0x92c   :  { %v408_v33 = vpack.c.b16 %v407_v31, %v407_v31 }
 0x92e   :  { %409 = vrot.lane.b32.xlu0 %v408_v33, %s1621_s28 }
 0x9a0   :  { %v410_v34 = vpop.permute.xlu0 %409 }
 0x9a1   :  { %1423 = vmatmul.msk.bf16.vlgmr.msrb.gmra.mxu2 %vm134_vm8, %v410_v34 }
 0xa24   :  { %v423_v37 = vpop.f32.mrf.mxu2 }
 0xa25   :  { %v427_v38 = vadd.f32 %v423_v37, %v100_v36  ;;  %v1501_v36 = vld [vmem:[%s2092_s4 + $0x8] sm:$0xff] }
 0xa26   :  { %758 = vmatpush.bf16.msra.mxu3 %v1501_v36 }
 0xa27   :  { %v428_v39 = vmul.f32 %v427_v38, %v1730_v14 }
 0xa29   :  { %v1424_v40 = vmul.f32 -1.442695, %v428_v39 }
 0xa2b   :  { %1544 = vpow2.f32 %v1424_v40 }
 0xa2c   :  { %v425_v41 = vpop.f32.mrf.mxu2 }
 0xa31   :  { %v1545_v42 = vpop.eup %1544 }
 0xa32   :  { %v432_v43 = vadd.f32 1.0, %v1545_v42 }
 0xa34   :  { %1546 = vrcp.f32 %v432_v43  ;;  %v444_v48 = vand.u32 2147483648, %v432_v43  ;;  %v442_v50 = vand.u32 2147483647, %v432_v43  ;;  %vm438_vm7 = vweird.f32 %v432_v43 }
 0xa36   :  { %v445_v52 = vor.u32 1.1754944e-38, %v444_v48  ;;  %vm443_vm10 = vcmp.eq.f32.partialorder %v442_v50, 8.507059e+37 }
 0xa3a   :  { %v1547_v45 = vpop.eup %1546 }
 0xa3b   :  { %v434_v46 = vmul.f32 %v1547_v45, %v432_v43  ;;  %vm439_vm6 = vweird.f32 %v1547_v45 }
 0xa3c   :  { %vm440_vm9 = vmor %vm438_vm7, %vm439_vm6 }
 0xa3d   :  { %v435_v47 = vsub.f32 1.0, %v434_v46  ;;  %v50_v46 = vld [vmem:[%s2090_s0 + $0x38] sm:$0xff] }
 0xa3f   :  { %v436_v49 = vmul.f32 %v1547_v45, %v435_v47 }
 0xa41   :  { %v437_v51 = vadd.f32 %v1547_v45, %v436_v49 }
 0xa43   :  { %v441_v53 = vsel %vm440_vm9, %v1547_v45, %v437_v51  ;;  %v49_v45 = vld [vmem:[%s2090_s0 + $0x30] sm:$0xff]  ;;  %v1848_v51 = vld [vmem:[%s2094_s5 + $0x8] sm:$0xff] }
 0xa44   :  { %v446_v55 = vsel %vm443_vm10, %v445_v52, %v441_v53  ;;  %v54_v48 = vpack.c.bf16 %v50_v46, %v49_v45  ;;  %812 = vmatpush.bf16.msrb.mxu1 %v1848_v51  ;;  %v1854_v52 = vld [vmem:[%s2094_s5] sm:$0xff]  ;;  %879 = vmatpush.bf16.msrb.mxu2 %v1848_v51 }
 0xa45   :  { %v448_v56 = vmul.f32 %v446_v55, %v1730_v14  ;;  %946 = vmatpush.bf16.msrb.mxu0 %v1848_v51 }
 0xa46   :  { %1407 = vmatmul.msk.bf16.gmra.mxu0 %vm67_vm0, %v54_v48 }
 0xa47   :  { %v449_v57 = vadd.f32 %v448_v56, %v1735_v32 }
 0xa48   :  { %813 = vmatpush.bf16.msrb.mxu1 %v1854_v52  ;;  %880 = vmatpush.bf16.msrb.mxu2 %v1854_v52 }
 0xa49   :  { %452 = vrot.lane.b32.xlu1 %v449_v57, %s1620_s27  ;;  %v450_v60 = vmul.f32 %v449_v57, %v391_v23  ;;  %947 = vmatpush.bf16.msrb.mxu0 %v1854_v52 }
 0xa4d   :  { %1147 = vmatpush.bf16.msra.mxu0 %v1848_v51 }
 0xa51   :  { %1148 = vmatpush.bf16.msra.mxu0 %v1854_v52 }
 0xabb   :  { %v453_v58 = vpop.permute.xlu1 %452 }
 0xabc   :  { %v455_v59 = vmul.f32 %v453_v58, %v449_v57 }
 0xabe   :  { %457 = vrot.lane.b32.xlu2 %v455_v59, %s1621_s28 }
 0xac3   :  { %v104_v55 = vpop.f32.mrf.mxu0 }
 0xac4   :  { %v105_v56 = vadd.f32 %v1721_v9, %v104_v55 }
 0xb18   :  { %v458_v61 = vpop.permute.xlu2 %457 }
 0xb19   :  { %v460_v62 = vadd.f32 %v458_v61, %v450_v60 }
 0xb1b   :  { %1548 = vtanh.f32 %v460_v62 }
 0xb21   :  { %v1549_v63 = vpop.eup %1548 }
 0xb22   :  { %463 = vrot.lane.b32.xlu0 %v1549_v63, %s1620_s27 }
 0xb94   :  { %v464_v0 = vpop.permute.xlu0 %463 }
 0xb95   :  { %v466_v1 = vmul.f32 %v464_v0, %v449_v57 }
 0xb97   :  { %v1806_v2 = vpack.c.bf16 %v466_v1, %v466_v1 }
 0xb99   :  { %v476_v3 = vunpack.c.l.b16 %v1806_v2 }
 0xb9b   :  { %v477_v4 = vpack.c.b16 %v476_v3, %v476_v3 }
 0xb9d   :  { %478 = vrot.lane.b32.xlu1 %v477_v4, %s1621_s28 }
 0xc0f   :  { %v479_v5 = vpop.permute.xlu1 %478 }
 0xc10   :  { %1425 = vmatmul.msk.bf16.vlgmr.msrb.gmra.mxu3 %vm134_vm8, %v479_v5 }
 0xc93   :  { %v492_v10 = vpop.f32.mrf.mxu3 }
 0xc94   :  { %v496_v11 = vadd.f32 %v492_v10, %v102_v8 }
 0xc96   :  { %v497_v12 = vmul.f32 %v496_v11, %v1730_v14 }
 0xc98   :  { %v1426_v13 = vmul.f32 -1.442695, %v497_v12 }
 0xc9a   :  { %1550 = vpow2.f32 %v1426_v13 }
 0xc9b   :  { %v494_v15 = vpop.f32.mrf.mxu3 }
 0xca0   :  { %v1551_v16 = vpop.eup %1550 }
 0xca1   :  { %v501_v17 = vadd.f32 1.0, %v1551_v16 }
 0xca3   :  { %1552 = vrcp.f32 %v501_v17  ;;  %v513_v22 = vand.u32 2147483648, %v501_v17  ;;  %v511_v24 = vand.u32 2147483647, %v501_v17  ;;  %vm507_vm12 = vweird.f32 %v501_v17 }
 0xca5   :  { %v514_v26 = vor.u32 1.1754944e-38, %v513_v22  ;;  %vm512_vm14 = vcmp.eq.f32.partialorder %v511_v24, 8.507059e+37 }
 0xca9   :  { %v1553_v18 = vpop.eup %1552 }
 0xcaa   :  { %v503_v20 = vmul.f32 %v1553_v18, %v501_v17  ;;  %vm508_vm11 = vweird.f32 %v1553_v18 }
 0xcab   :  { %vm509_vm13 = vmor %vm507_vm12, %vm508_vm11 }
 0xcac   :  { %v504_v21 = vsub.f32 1.0, %v503_v20 }
 0xcae   :  { %v505_v23 = vmul.f32 %v1553_v18, %v504_v21 }
 0xcb0   :  { %v506_v25 = vadd.f32 %v1553_v18, %v505_v23 }
 0xcb2   :  { %v510_v27 = vsel %vm509_vm13, %v1553_v18, %v506_v25 }
 0xcb3   :  { %v515_v28 = vsel %vm512_vm14, %v514_v26, %v510_v27 }
 0xcb4   :  { %v517_v29 = vmul.f32 %v515_v28, %v1730_v14 }
 0xcb6   :  { %v518_v31 = vadd.f32 %v517_v29, %v1735_v32 }
 0xcb8   :  { %521 = vrot.lane.b32.xlu2 %v518_v31, %s1620_s27  ;;  %v519_v37 = vmul.f32 %v518_v31, %v460_v62  ;;  %v1874_v62 = vld [vmem:[%s2093_s6] ss:$0 sm:$0xff] }
 0xcc0   :  { %193 = vrot.lane.b32.xlu2 %v1742_v44, %s1621_s28  ;;  %v1500_v44 = vld [vmem:[%s2092_s4] sm:$0xff] }
 0xcc1   :  { %759 = vmatpush.bf16.msra.mxu3 %v1500_v44 }
 0xd12   :  { %v522_v33 = vpop.permute.xlu2 %521 }
 0xd13   :  { %v524_v34 = vmul.f32 %v522_v33, %v518_v31 }
 0xd15   :  { %526 = vrot.lane.b32.xlu0 %v524_v34, %s1621_s28 }
 0xd1a   :  { %v194_v35 = vpop.permute.xlu2 %193 }
 0xd1b   :  { %197 = vst.msk [vmem:[#allocation2] sm:$0xf] %vm196_vm15, %v194_v35 }
 0xd1d   :  { %262 = vrot.lane.b32.xlu0 %v1763_v19, %s1621_s28 }
 0xd87   :  { %v527_v38 = vpop.permute.xlu0 %526 }
 0xd88   :  { %v1828_v39 = vadd.f32 %v527_v38, %v519_v37 }
 0xd8a   :  { %1554 = vtanh.f32 %v1828_v39 }
 0xd8f   :  { %v263_v40 = vpop.permute.xlu0 %262 }
 0xd90   :  { %v1555_v41 = vpop.eup %1554  ;;  %266 = vst.msk [vmem:[#allocation2 + $0x4] sm:$0xf] %vm196_vm15, %v263_v40 }
 0xd91   :  { %532 = vrot.lane.b32.xlu1 %v1555_v41, %s1620_s27 }
 0xd97   :  { %v1496_v19 = vld [vmem:[#allocation2] sm:$0xff] }
 0xd98   :  { %1455 = vmatmul.msk.bf16.vlgmr.msra.gmra.mxu3 %vm134_vm8, %v1496_v19 }
 0xe03   :  { %v533_v42 = vpop.permute.xlu1 %532 }
 0xe04   :  { %v535_v43 = vmul.f32 %v533_v42, %v518_v31 }
 0xe06   :  { %v1840_v47 = vpack.c.bf16 %v535_v43, %v535_v43 }
 0xe08   :  { %v545_v49 = vunpack.c.l.b16 %v1840_v47 }
 0xe0a   :  { %v546_v50 = vpack.c.b16 %v545_v49, %v545_v49 }
 0xe0c   :  { %547 = vrot.lane.b32.xlu1 %v546_v50, %s1621_s28 }
 0xe7e   :  { %v548_v53 = vpop.permute.xlu1 %547 }
 0xe7f   :  { %1427 = vmatmul.msk.bf16.vlgmr.msra.gmra.mxu1 %vm134_vm8, %v548_v53 }
 0xe80   :  { %1013 = vmatpush.bf16.msra.mxu1 %v1848_v51 }
 0xe84   :  { %1014 = vmatpush.bf16.msra.mxu1 %v1854_v52 }
 0xe8f   :  { %814 = vmatmul.bf16.vlgmr.msrb.gmra.mxu1 %v1617_v6  ;;  %v761_v6 = vpop.f32.mrf.mxu3 }
 0xe90   :  { %1214 = vmatpush.bf16.msrb.mxu1 %v1848_v51  ;;  %v762_v1 = vadd.f32 %v1874_v62, %v761_v6 }
 0xe94   :  { %1215 = vmatpush.bf16.msrb.mxu1 %v1854_v52 }
 0xefc   :  { %v561_v57 = vpop.f32.mrf.mxu1 }
 0xefd   :  { %v565_v58 = vadd.f32 %v561_v57, %v105_v56 }
 0xeff   :  { %v566_v59 = vmul.f32 %v565_v58, %v1730_v14 }
 0xf01   :  { %v1428_v60 = vmul.f32 -1.442695, %v566_v59 }
 0xf03   :  { %1556 = vpow2.f32 %v1428_v60 }
 0xf04   :  { %v563_v61 = vpop.f32.mrf.mxu1 }
 0xf09   :  { %v1557_v63 = vpop.eup %1556 }
 0xf0a   :  { %v570_v0 = vadd.f32 1.0, %v1557_v63 }
 0xf0c   :  { %1558 = vrcp.f32 %v570_v0  ;;  %v815_v3 = vpop.f32.mrf.mxu1  ;;  %v582_v12 = vand.u32 2147483648, %v570_v0  ;;  %v580_v15 = vand.u32 2147483647, %v570_v0  ;;  %vm576_vm1 = vweird.f32 %v570_v0 }
 0xf0d   :  { %v819_v9 = vadd.f32 %v815_v3, %v762_v1 }
 0xf0e   :  { %v583_v20 = vor.u32 1.1754944e-38, %v582_v12  ;;  %vm581_vm3 = vcmp.eq.f32.partialorder %v580_v15, 8.507059e+37 }
 0xf0f   :  { %v820_v4 = vmul.f32 %v819_v9, %v1730_v14 }
 0xf11   :  { %v1467_v5 = vmul.f32 -1.442695, %v820_v4  ;;  %v763_v4 = vpop.f32.mrf.mxu3 }
 0xf12   :  { %v1559_v7 = vpop.eup %1558 }
 0xf13   :  { %v572_v8 = vmul.f32 %v1559_v7, %v570_v0  ;;  %1560 = vpow2.f32 %v1467_v5  ;;  %vm577_vm0 = vweird.f32 %v1559_v7  ;;  %v764_v5 = vadd.f32 %v1874_v62, %v763_v4 }
 0xf14   :  { %v817_v10 = vpop.f32.mrf.mxu1  ;;  %vm578_vm2 = vmor %vm576_vm1, %vm577_vm0 }
 0xf15   :  { %v573_v11 = vsub.f32 1.0, %v572_v8 }
 0xf17   :  { %v574_v13 = vmul.f32 %v1559_v7, %v573_v11 }
 0xf19   :  { %v1561_v16 = vpop.eup %1560  ;;  %v575_v17 = vadd.f32 %v1559_v7, %v574_v13 }
 0xf1a   :  { %v824_v18 = vadd.f32 1.0, %v1561_v16 }
 0xf1b   :  { %v579_v21 = vsel %vm578_vm2, %v1559_v7, %v575_v17 }
 0xf1c   :  { %1562 = vrcp.f32 %v824_v18  ;;  %v584_v22 = vsel %vm581_vm3, %v583_v20, %v579_v21  ;;  %v836_v28 = vand.u32 2147483648, %v824_v18  ;;  %v834_v31 = vand.u32 2147483647, %v824_v18 }
 0xf1d   :  { %v586_v23 = vmul.f32 %v584_v22, %v1730_v14  ;;  %vm830_vm5 = vweird.f32 %v824_v18 }
 0xf1e   :  { %v837_v34 = vor.u32 1.1754944e-38, %v836_v28  ;;  %vm835_vm7 = vcmp.eq.f32.partialorder %v834_v31, 8.507059e+37 }
 0xf1f   :  { %v587_v24 = vadd.f32 %v586_v23, %v1735_v32 }
 0xf21   :  { %590 = vrot.lane.b32.xlu2 %v587_v24, %s1620_s27  ;;  %v588_v42 = vmul.f32 %v587_v24, %v1828_v39 }
 0xf22   :  { %v1563_v25 = vpop.eup %1562 }
 0xf23   :  { %v826_v26 = vmul.f32 %v1563_v25, %v824_v18  ;;  %vm831_vm4 = vweird.f32 %v1563_v25 }
 0xf24   :  { %vm832_vm6 = vmor %vm830_vm5, %vm831_vm4 }
 0xf25   :  { %v827_v27 = vsub.f32 1.0, %v826_v26 }
 0xf27   :  { %v828_v29 = vmul.f32 %v1563_v25, %v827_v27 }
 0xf29   :  { %v829_v33 = vadd.f32 %v1563_v25, %v828_v29 }
 0xf2b   :  { %v833_v35 = vsel %vm832_vm6, %v1563_v25, %v829_v33 }
 0xf2c   :  { %v838_v36 = vsel %vm835_vm7, %v837_v34, %v833_v35 }
 0xf2d   :  { %v840_v44 = vmul.f32 %v838_v36, %v1730_v14 }
 0xf2f   :  { %v841_v37 = vadd.f32 %v840_v44, %v1735_v32 }
 0xf31   :  { %844 = vrot.lane.b32.xlu0 %v841_v37, %s1620_s27  ;;  %v842_v48 = vmul.f32 0.0, %v841_v37 }
 0xf7b   :  { %v591_v38 = vpop.permute.xlu2 %590 }
 0xf7c   :  { %v593_v40 = vmul.f32 %v591_v38, %v587_v24 }
 0xf7e   :  { %595 = vrot.lane.b32.xlu1 %v593_v40, %s1621_s28 }
 0xfa3   :  { %v845_v41 = vpop.permute.xlu0 %844 }
 0xfa4   :  { %v847_v19 = vmul.f32 %v845_v41, %v841_v37 }
 0xfa6   :  { %849 = vrot.lane.b32.xlu2 %v847_v19, %s1621_s28  ;;  %v1927_v19 = vpop.f32.mrf.mxu0 }
 0xff0   :  { %v596_v43 = vpop.permute.xlu1 %595 }
 0xff1   :  { %v1887_v45 = vadd.f32 %v596_v43, %v588_v42 }
 0xff3   :  { %1564 = vtanh.f32 %v1887_v45 }
 0xff9   :  { %v1565_v46 = vpop.eup %1564 }
 0xffa   :  { %601 = vrot.lane.b32.xlu0 %v1565_v46, %s1620_s27 }
0x1000   :  { %v850_v49 = vpop.permute.xlu2 %849 }
0x1001   :  { %v852_v50 = vadd.f32 %v850_v49, %v842_v48 }
0x1003   :  { %1566 = vtanh.f32 %v852_v50 }
0x1009   :  { %v1567_v53 = vpop.eup %1566 }
0x100a   :  { %855 = vrot.lane.b32.xlu1 %v1567_v53, %s1620_s27 }
0x106c   :  { %v602_v55 = vpop.permute.xlu0 %601 }
0x106d   :  { %v604_v56 = vmul.f32 %v602_v55, %v587_v24 }
0x106f   :  { %v1892_v57 = vpack.c.bf16 %v604_v56, %v604_v56 }
0x1071   :  { %v614_v39 = vunpack.c.l.b16 %v1892_v57 }
0x1073   :  { %v615_v58 = vpack.c.b16 %v614_v39, %v614_v39 }
0x1075   :  { %616 = vrot.lane.b32.xlu2 %v615_v58, %s1621_s28 }
0x107c   :  { %v856_v59 = vpop.permute.xlu1 %855 }
0x107d   :  { %v858_v60 = vmul.f32 %v856_v59, %v841_v37 }
0x107f   :  { %v1896_v61 = vpack.c.bf16 %v858_v60, %v858_v60 }
0x1081   :  { %v866_v6 = vunpack.c.l.b16 %v1896_v61 }
0x1083   :  { %v867_v63 = vpack.c.b16 %v866_v6, %v866_v6 }
0x1085   :  { %868 = vrot.lane.b32.xlu0 %v867_v63, %s1621_s28 }
0x10cf   :  { %v617_v0 = vpop.permute.xlu2 %616 }
0x10d0   :  { %1429 = vmatmul.msk.bf16.vlgmr.msra.gmra.mxu2 %vm134_vm8, %v617_v0 }
0x10d1   :  { %1080 = vmatpush.bf16.msra.mxu2 %v1848_v51 }
0x10d5   :  { %1081 = vmatpush.bf16.msra.mxu2 %v1854_v52 }
0x10f7   :  { %v869_v1 = vpop.permute.xlu0 %868 }
0x10f8   :  { %1468 = vmatmul.msk.bf16.vlgmr.msrb.gmra.mxu2 %vm134_vm8, %v869_v1 }
0x10f9   :  { %1281 = vmatpush.bf16.msrb.mxu2 %v1848_v51 }
0x10fd   :  { %1282 = vmatpush.bf16.msrb.mxu2 %v1854_v52 }
0x1153   :  { %v1906_v3 = vpop.f32.mrf.mxu2 }
0x115b   :  { %v632_v9 = vpop.f32.mrf.mxu2 }
0x117b   :  { %v882_v7 = vpop.f32.mrf.mxu2 }
0x117c   :  { %v886_v8 = vadd.f32 %v882_v7, %v764_v5 }
0x117e   :  { %v887_v10 = vmul.f32 %v886_v8, %v1730_v14 }
0x1180   :  { %v1469_v11 = vmul.f32 -1.442695, %v887_v10 }
0x1182   :  { %1568 = vpow2.f32 %v1469_v11 }
0x1183   :  { %v884_v12 = vpop.f32.mrf.mxu2 }
0x1188   :  { %v1569_v13 = vpop.eup %1568 }
0x1189   :  { %v891_v15 = vadd.f32 1.0, %v1569_v13 }
0x118b   :  { %1570 = vrcp.f32 %v891_v15  ;;  %v903_v52 = vand.u32 2147483648, %v891_v15  ;;  %v901_v20 = vand.u32 2147483647, %v891_v15  ;;  %vm897_vm10 = vweird.f32 %v891_v15 }
0x118d   :  { %v904_v22 = vor.u32 1.1754944e-38, %v903_v52  ;;  %vm902_vm12 = vcmp.eq.f32.partialorder %v901_v20, 8.507059e+37 }
0x1191   :  { %v1571_v16 = vpop.eup %1570 }
0x1192   :  { %v893_v51 = vmul.f32 %v1571_v16, %v891_v15  ;;  %vm898_vm9 = vweird.f32 %v1571_v16 }
0x1193   :  { %vm899_vm11 = vmor %vm897_vm10, %vm898_vm9 }
0x1194   :  { %v894_v17 = vsub.f32 1.0, %v893_v51 }
0x1196   :  { %v895_v18 = vmul.f32 %v1571_v16, %v894_v17 }
0x1198   :  { %v896_v21 = vadd.f32 %v1571_v16, %v895_v18 }
0x119a   :  { %v900_v23 = vsel %vm899_vm11, %v1571_v16, %v896_v21 }
0x119b   :  { %v905_v24 = vsel %vm902_vm12, %v904_v22, %v900_v23 }
0x119c   :  { %v907_v25 = vmul.f32 %v905_v24, %v1730_v14 }
0x119e   :  { %v908_v26 = vadd.f32 %v907_v25, %v1735_v32 }
0x11a0   :  { %911 = vrot.lane.b32.xlu1 %v908_v26, %s1620_s27  ;;  %v909_v31 = vmul.f32 %v908_v26, %v852_v50 }
0x11a8   :  { %331 = vrot.lane.b32.xlu1 %v1775_v54, %s1621_s28 }
0x1212   :  { %v912_v27 = vpop.permute.xlu1 %911 }
0x1213   :  { %v914_v28 = vmul.f32 %v912_v27, %v908_v26 }
0x1215   :  { %916 = vrot.lane.b32.xlu2 %v914_v28, %s1621_s28 }
0x121a   :  { %v332_v29 = vpop.permute.xlu1 %331 }
0x121b   :  { %335 = vst.msk [vmem:[#allocation2 + $0x8] sm:$0xf] %vm196_vm15, %v332_v29 }
0x121d   :  { %400 = vrot.lane.b32.xlu2 %v1794_v30, %s1621_s28 }
0x126f   :  { %v917_v33 = vpop.permute.xlu2 %916 }
0x1270   :  { %v919_v34 = vadd.f32 %v917_v33, %v909_v31 }
0x1272   :  { %1572 = vtanh.f32 %v919_v34 }
0x1277   :  { %v401_v35 = vpop.permute.xlu2 %400 }
0x1278   :  { %v1573_v36 = vpop.eup %1572  ;;  %404 = vst.msk [vmem:[#allocation2 + $0xc] sm:$0xf] %vm196_vm15, %v401_v35 }
0x1279   :  { %922 = vrot.lane.b32.xlu0 %v1573_v36, %s1620_s27 }
0x127f   :  { %v1497_v54 = vld [vmem:[#allocation2 + $0x8] sm:$0xff] }
0x1280   :  { %1456 = vmatmul.msk.bf16.gmra.mxu3 %vm134_vm8, %v1497_v54 }
0x12eb   :  { %v923_v44 = vpop.permute.xlu0 %922 }
0x12ec   :  { %v925_v37 = vmul.f32 %v923_v44, %v908_v26 }
0x12ee   :  { %v1922_v38 = vpack.c.bf16 %v925_v37, %v925_v37 }
0x12f0   :  { %v933_v40 = vunpack.c.l.b16 %v1922_v38 }
0x12f2   :  { %v934_v30 = vpack.c.b16 %v933_v40, %v933_v40 }
0x12f4   :  { %935 = vrot.lane.b32.xlu0 %v934_v30, %s1621_s28 }
0x1303   :  { %v766_v42 = vpop.f32.mrf.mxu3 }
0x1304   :  { %v767_v43 = vadd.f32 %v1874_v62, %v766_v42 }
0x130b   :  { %v768_v21 = vpop.f32.mrf.mxu3 }
0x130c   :  { %v769_v22 = vadd.f32 %v1874_v62, %v768_v21 }
0x1366   :  { %v936_v41 = vpop.permute.xlu0 %935 }
0x1367   :  { %1470 = vmatmul.msk.bf16.vlgmr.msrb.gmra.mxu0 %vm134_vm8, %v936_v41 }
0x13e4   :  { %v949_v46 = vpop.f32.mrf.mxu0 }
0x13e5   :  { %v953_v48 = vadd.f32 %v949_v46, %v767_v43 }
0x13e7   :  { %v954_v49 = vmul.f32 %v953_v48, %v1730_v14 }
0x13e9   :  { %v1471_v50 = vmul.f32 -1.442695, %v954_v49 }
0x13eb   :  { %1574 = vpow2.f32 %v1471_v50 }
0x13ec   :  { %v951_v53 = vpop.f32.mrf.mxu0 }
0x13f1   :  { %v1575_v55 = vpop.eup %1574 }
0x13f2   :  { %v958_v56 = vadd.f32 1.0, %v1575_v55 }
0x13f4   :  { %1576 = vrcp.f32 %v958_v56  ;;  %v970_v60 = vand.u32 2147483648, %v958_v56  ;;  %v968_v63 = vand.u32 2147483647, %v958_v56  ;;  %vm964_vm14 = vweird.f32 %v958_v56 }
0x13f6   :  { %v971_v1 = vor.u32 1.1754944e-38, %v970_v60  ;;  %vm969_vm1 = vcmp.eq.f32.partialorder %v968_v63, 8.507059e+37 }
0x13fa   :  { %v1577_v39 = vpop.eup %1576 }
0x13fb   :  { %v960_v58 = vmul.f32 %v1577_v39, %v958_v56  ;;  %vm965_vm13 = vweird.f32 %v1577_v39 }
0x13fc   :  { %vm966_vm0 = vmor %vm964_vm14, %vm965_vm13 }
0x13fd   :  { %v961_v59 = vsub.f32 1.0, %v960_v58 }
0x13ff   :  { %v962_v6 = vmul.f32 %v1577_v39, %v961_v59 }
0x1401   :  { %v963_v0 = vadd.f32 %v1577_v39, %v962_v6 }
0x1403   :  { %v967_v9 = vsel %vm966_vm0, %v1577_v39, %v963_v0 }
0x1404   :  { %v972_v4 = vsel %vm969_vm1, %v971_v1, %v967_v9 }
0x1405   :  { %v974_v5 = vmul.f32 %v972_v4, %v1730_v14 }
0x1407   :  { %v975_v7 = vadd.f32 %v974_v5, %v1735_v32 }
0x1409   :  { %978 = vrot.lane.b32.xlu1 %v975_v7, %s1620_s27  ;;  %v976_v11 = vmul.f32 %v975_v7, %v919_v34 }
0x147b   :  { %v979_v8 = vpop.permute.xlu1 %978 }
0x147c   :  { %v981_v10 = vmul.f32 %v979_v8, %v975_v7 }
0x147e   :  { %983 = vrot.lane.b32.xlu2 %v981_v10, %s1621_s28 }
0x14d8   :  { %v984_v12 = vpop.permute.xlu2 %983 }
0x14d9   :  { %v986_v13 = vadd.f32 %v984_v12, %v976_v11 }
0x14db   :  { %1578 = vtanh.f32 %v986_v13 }
0x14e1   :  { %v1579_v15 = vpop.eup %1578 }
0x14e2   :  { %989 = vrot.lane.b32.xlu0 %v1579_v15, %s1620_s27 }
0x1554   :  { %v990_v16 = vpop.permute.xlu0 %989 }
0x1555   :  { %v992_v51 = vmul.f32 %v990_v16, %v975_v7 }
0x1557   :  { %v1936_v17 = vpack.c.bf16 %v992_v51, %v992_v51 }
0x1559   :  { %v1000_v52 = vunpack.c.l.b16 %v1936_v17 }
0x155b   :  { %v1001_v18 = vpack.c.b16 %v1000_v52, %v1000_v52 }
0x155d   :  { %1002 = vrot.lane.b32.xlu1 %v1001_v18, %s1621_s28 }
0x15cf   :  { %v1003_v20 = vpop.permute.xlu1 %1002 }
0x15d0   :  { %1472 = vmatmul.msk.bf16.vlgmr.msra.gmra.mxu1 %vm134_vm8, %v1003_v20 }
0x164d   :  { %v1016_v23 = vpop.f32.mrf.mxu1 }
0x164e   :  { %v1020_v24 = vadd.f32 %v1016_v23, %v769_v22 }
0x1650   :  { %v1021_v25 = vmul.f32 %v1020_v24, %v1730_v14  ;;  %v1616_v24 = vld [vmem:[%s2091_s3] ss:$0 sm:$0xff]  ;;  %s1622_s3 = smov 96  }
0x1652   :  { %v1473_v26 = vmul.f32 -1.442695, %v1021_v25  ;;  %v107_v25 = vadd.f32 %v1616_v24, %v1927_v19 }
0x1654   :  { %1580 = vpow2.f32 %v1473_v26  ;;  %v634_v26 = vadd.f32 %v1906_v3, %v107_v25 }
0x1655   :  { %v1018_v27 = vpop.f32.mrf.mxu1 }
0x1656   :  { %v635_v27 = vmul.f32 %v634_v26, %v1730_v14 }
0x165a   :  { %v1581_v28 = vpop.eup %1580 }
0x165b   :  { %v1025_v29 = vadd.f32 1.0, %v1581_v28  ;;  %v1430_v28 = vmul.f32 -1.442695, %v635_v27 }
0x165d   :  { %1582 = vrcp.f32 %v1025_v29  ;;  %v1037_v35 = vand.u32 2147483648, %v1025_v29  ;;  %v1035_v54 = vand.u32 2147483647, %v1025_v29  ;;  %vm1031_vm3 = vweird.f32 %v1025_v29 }
0x165f   :  { %v1038_v37 = vor.u32 1.1754944e-38, %v1037_v35  ;;  %vm1036_vm5 = vcmp.eq.f32.partialorder %v1035_v54, 8.507059e+37 }
0x1663   :  { %v1583_v31 = vpop.eup %1582 }
0x1664   :  { %v1027_v33 = vmul.f32 %v1583_v31, %v1025_v29  ;;  %vm1032_vm2 = vweird.f32 %v1583_v31 }
0x1665   :  { %vm1033_vm4 = vmor %vm1031_vm3, %vm1032_vm2 }
0x1666   :  { %v1028_v34 = vsub.f32 1.0, %v1027_v33 }
0x1668   :  { %v1029_v36 = vmul.f32 %v1583_v31, %v1028_v34 }
0x166a   :  { %v1030_v44 = vadd.f32 %v1583_v31, %v1029_v36 }
0x166c   :  { %v1034_v40 = vsel %vm1033_vm4, %v1583_v31, %v1030_v44 }
0x166d   :  { %v1039_v30 = vsel %vm1036_vm5, %v1038_v37, %v1034_v40 }
0x166e   :  { %v1041_v41 = vmul.f32 %v1039_v30, %v1730_v14 }
0x1670   :  { %v1042_v42 = vadd.f32 %v1041_v41, %v1735_v32 }
0x1672   :  { %1045 = vrot.lane.b32.xlu2 %v1042_v42, %s1620_s27  ;;  %v1043_v49 = vmul.f32 %v1042_v42, %v986_v13 }
0x167a   :  { %469 = vrot.lane.b32.xlu2 %v1806_v2, %s1621_s28 }
0x16cc   :  { %v1046_v43 = vpop.permute.xlu2 %1045 }
0x16cd   :  { %v1048_v46 = vmul.f32 %v1046_v43, %v1042_v42 }
0x16cf   :  { %1050 = vrot.lane.b32.xlu0 %v1048_v46, %s1621_s28 }
0x16d4   :  { %v470_v48 = vpop.permute.xlu2 %469 }
0x16d5   :  { %473 = vst.msk [vmem:[#allocation2 + $0x10] sm:$0xf] %vm196_vm15, %v470_v48 }
0x16d7   :  { %538 = vrot.lane.b32.xlu0 %v1840_v47, %s1621_s28 }
0x1741   :  { %v1051_v50 = vpop.permute.xlu0 %1050 }
0x1742   :  { %v1952_v53 = vadd.f32 %v1051_v50, %v1043_v49 }
0x1744   :  { %1584 = vtanh.f32 %v1952_v53 }
0x1749   :  { %v539_v55 = vpop.permute.xlu0 %538 }
0x174a   :  { %v1585_v56 = vpop.eup %1584  ;;  %542 = vst.msk [vmem:[#allocation2 + $0x14] sm:$0xf] %vm196_vm15, %v539_v55 }
0x174b   :  { %1056 = vrot.lane.b32.xlu1 %v1585_v56, %s1620_s27 }
0x1751   :  { %v1498_v2 = vld [vmem:[#allocation2 + $0x10] sm:$0xff] }
0x1752   :  { %1457 = vmatmul.msk.bf16.gmra.mxu3 %vm134_vm8, %v1498_v2 }
0x17bd   :  { %v1057_v39 = vpop.permute.xlu1 %1056 }
0x17be   :  { %v1059_v58 = vmul.f32 %v1057_v39, %v1042_v42 }
0x17c0   :  { %v1958_v59 = vpack.c.bf16 %v1059_v58, %v1059_v58 }
0x17c2   :  { %v1067_v47 = vunpack.c.l.b16 %v1958_v59 }
0x17c4   :  { %v1068_v60 = vpack.c.b16 %v1067_v47, %v1067_v47 }
0x17c6   :  { %1069 = vrot.lane.b32.xlu1 %v1068_v60, %s1621_s28 }
0x17d5   :  { %v771_v63 = vpop.f32.mrf.mxu3 }
0x17d6   :  { %v772_v0 = vadd.f32 %v1874_v62, %v771_v63 }
0x1838   :  { %v1070_v6 = vpop.permute.xlu1 %1069 }
0x1839   :  { %1474 = vmatmul.msk.bf16.vlgmr.msra.gmra.mxu2 %vm134_vm8, %v1070_v6  ;;  %v773_v6 = vpop.f32.mrf.mxu3 }
0x183a   :  { %v774_v63 = vadd.f32 %v1874_v62, %v773_v6 }
0x18bc   :  { %v1083_v1 = vpop.f32.mrf.mxu2 }
0x18bd   :  { %v1087_v9 = vadd.f32 %v1083_v1, %v772_v0 }
0x18bf   :  { %v1088_v4 = vmul.f32 %v1087_v9, %v1730_v14 }
0x18c1   :  { %v1475_v5 = vmul.f32 -1.442695, %v1088_v4 }
0x18c3   :  { %1586 = vpow2.f32 %v1475_v5 }
0x18c4   :  { %v1085_v7 = vpop.f32.mrf.mxu2 }
0x18c9   :  { %v1587_v8 = vpop.eup %1586 }
0x18ca   :  { %v1092_v10 = vadd.f32 1.0, %v1587_v8 }
0x18cc   :  { %1588 = vrcp.f32 %v1092_v10  ;;  %v1104_v15 = vand.u32 2147483648, %v1092_v10  ;;  %v1102_v51 = vand.u32 2147483647, %v1092_v10  ;;  %vm1098_vm7 = vweird.f32 %v1092_v10 }
0x18cd   :  { %1590 = vpow2.f32 %v1430_v28 }
0x18ce   :  { %v1105_v18 = vor.u32 1.1754944e-38, %v1104_v15  ;;  %vm1103_vm10 = vcmp.eq.f32.partialorder %v1102_v51, 8.507059e+37 }
0x18d2   :  { %v1589_v11 = vpop.eup %1588 }
0x18d3   :  { %v1094_v12 = vmul.f32 %v1589_v11, %v1092_v10  ;;  %vm1099_vm6 = vweird.f32 %v1589_v11  ;;  %v1591_v29 = vpop.eup %1590 }
0x18d4   :  { %vm1100_vm9 = vmor %vm1098_vm7, %vm1099_vm6  ;;  %v639_v31 = vadd.f32 1.0, %v1591_v29 }
0x18d5   :  { %v1095_v13 = vsub.f32 1.0, %v1094_v12 }
0x18d6   :  { %1592 = vrcp.f32 %v639_v31  ;;  %v651_v44 = vand.u32 2147483648, %v639_v31  ;;  %vm645_vm12 = vweird.f32 %v639_v31  ;;  %v649_v37 = vand.u32 2147483647, %v639_v31 }
0x18d7   :  { %v1096_v16 = vmul.f32 %v1589_v11, %v1095_v13 }
0x18d8   :  { %v652_v3 = vor.u32 1.1754944e-38, %v651_v44  ;;  %vm650_vm14 = vcmp.eq.f32.partialorder %v649_v37, 8.507059e+37 }
0x18d9   :  { %v1097_v52 = vadd.f32 %v1589_v11, %v1096_v16 }
0x18db   :  { %v1101_v20 = vsel %vm1100_vm9, %v1589_v11, %v1097_v52 }
0x18dc   :  { %v1106_v21 = vsel %vm1103_vm10, %v1105_v18, %v1101_v20  ;;  %v1593_v33 = vpop.eup %1592 }
0x18dd   :  { %v1108_v22 = vmul.f32 %v1106_v21, %v1730_v14  ;;  %v641_v34 = vmul.f32 %v1593_v33, %v639_v31  ;;  %vm646_vm11 = vweird.f32 %v1593_v33 }
0x18de   :  { %vm647_vm13 = vmor %vm645_vm12, %vm646_vm11 }
0x18df   :  { %v1109_v23 = vadd.f32 %v1108_v22, %v1735_v32  ;;  %v642_v35 = vsub.f32 1.0, %v641_v34 }
0x18e1   :  { %1112 = vrot.lane.b32.xlu2 %v1109_v23, %s1620_s27  ;;  %v643_v36 = vmul.f32 %v1593_v33, %v642_v35  ;;  %v1110_v46 = vmul.f32 %v1109_v23, %v1952_v53 }
0x18e3   :  { %v644_v54 = vadd.f32 %v1593_v33, %v643_v36 }
0x18e5   :  { %v648_v19 = vsel %vm647_vm13, %v1593_v33, %v644_v54 }
0x18e6   :  { %v653_v41 = vsel %vm650_vm14, %v652_v3, %v648_v19 }
0x18e7   :  { %v655_v42 = vmul.f32 %v653_v41, %v1730_v14 }
0x18e9   :  { %v656_v43 = vadd.f32 %v655_v42, %v1735_v32 }
0x18eb   :  { %v657_v21 = vmul.f32 %v656_v43, %v1887_v45 }
0x193b   :  { %v1113_v40 = vpop.permute.xlu2 %1112 }
0x193c   :  { %v1115_v30 = vmul.f32 %v1113_v40, %v1109_v23 }
0x193e   :  { %1117 = vrot.lane.b32.xlu0 %v1115_v30, %s1621_s28 }
0x1946   :  { %659 = vrot.lane.b32.xlu0 %v656_v43, %s1620_s27 }
0x19b0   :  { %v1118_v48 = vpop.permute.xlu0 %1117 }
0x19b1   :  { %v1120_v49 = vadd.f32 %v1118_v48, %v1110_v46 }
0x19b3   :  { %1594 = vtanh.f32 %v1120_v49 }
0x19b8   :  { %v660_v47 = vpop.permute.xlu0 %659 }
0x19b9   :  { %v1595_v50 = vpop.eup %1594  ;;  %v662_v60 = vmul.f32 %v660_v47, %v656_v43 }
0x19ba   :  { %1123 = vrot.lane.b32.xlu1 %v1595_v50, %s1620_s27 }
0x1a2c   :  { %v1124_v55 = vpop.permute.xlu1 %1123 }
0x1a2d   :  { %v1126_v56 = vmul.f32 %v1124_v55, %v1109_v23 }
0x1a2f   :  { %v1980_v2 = vpack.c.bf16 %v1126_v56, %v1126_v56 }
0x1a31   :  { %v1134_v39 = vunpack.c.l.b16 %v1980_v2 }
0x1a33   :  { %v1135_v58 = vpack.c.b16 %v1134_v39, %v1134_v39 }
0x1a35   :  { %1136 = vrot.lane.b32.xlu2 %v1135_v58, %s1621_s28 }
0x1a3d   :  { %664 = vrot.lane.b32.xlu2 %v662_v60, %s1621_s28 }
0x1a8f   :  { %v1137_v53 = vpop.permute.xlu2 %1136 }
0x1a90   :  { %1476 = vmatmul.msk.bf16.vlgmr.msra.gmra.mxu0 %vm134_vm8, %v1137_v53 }
0x1a97   :  { %v665_v18 = vpop.permute.xlu2 %664 }
0x1a98   :  { %v1990_v24 = vadd.f32 %v665_v18, %v657_v21 }
0x1b0d   :  { %v1150_v0 = vpop.f32.mrf.mxu0 }
0x1b0e   :  { %v1154_v1 = vadd.f32 %v1150_v0, %v774_v63 }
0x1b10   :  { %v1155_v9 = vmul.f32 %v1154_v1, %v1730_v14 }
0x1b12   :  { %v1477_v4 = vmul.f32 -1.442695, %v1155_v9 }
0x1b14   :  { %1596 = vpow2.f32 %v1477_v4 }
0x1b15   :  { %v1152_v5 = vpop.f32.mrf.mxu0 }
0x1b1a   :  { %v1597_v7 = vpop.eup %1596 }
0x1b1b   :  { %v1159_v8 = vadd.f32 1.0, %v1597_v7 }
0x1b1d   :  { %1598 = vrcp.f32 %v1159_v8  ;;  %v1171_v13 = vand.u32 2147483648, %v1159_v8  ;;  %v1169_v16 = vand.u32 2147483647, %v1159_v8  ;;  %vm1165_vm1 = vweird.f32 %v1159_v8 }
0x1b1e   :  { %1600 = vtanh.f32 %v1990_v24 }
0x1b1f   :  { %v1172_v52 = vor.u32 1.1754944e-38, %v1171_v13  ;;  %vm1170_vm3 = vcmp.eq.f32.partialorder %v1169_v16, 8.507059e+37 }
0x1b23   :  { %v1599_v10 = vpop.eup %1598 }
0x1b24   :  { %v1161_v11 = vmul.f32 %v1599_v10, %v1159_v8  ;;  %vm1166_vm0 = vweird.f32 %v1599_v10  ;;  %v1601_v26 = vpop.eup %1600 }
0x1b25   :  { %vm1167_vm2 = vmor %vm1165_vm1, %vm1166_vm0 }
0x1b26   :  { %v1162_v12 = vsub.f32 1.0, %v1161_v11 }
0x1b28   :  { %v1163_v15 = vmul.f32 %v1599_v10, %v1162_v12 }
0x1b2a   :  { %v1164_v51 = vadd.f32 %v1599_v10, %v1163_v15 }
0x1b2c   :  { %v1168_v20 = vsel %vm1167_vm2, %v1599_v10, %v1164_v51 }
0x1b2d   :  { %v1173_v22 = vsel %vm1170_vm3, %v1172_v52, %v1168_v20 }
0x1b2e   :  { %v1175_v23 = vmul.f32 %v1173_v22, %v1730_v14 }
0x1b30   :  { %v1176_v25 = vadd.f32 %v1175_v23, %v1735_v32 }
0x1b32   :  { %1179 = vrot.lane.b32.xlu1 %v1176_v25, %s1620_s27  ;;  %v1177_v33 = vmul.f32 %v1176_v25, %v1120_v49 }
0x1b3a   :  { %670 = vrot.lane.b32.xlu1 %v1601_v26, %s1620_s27 }
0x1ba4   :  { %v1180_v27 = vpop.permute.xlu1 %1179 }
0x1ba5   :  { %v1182_v28 = vmul.f32 %v1180_v27, %v1176_v25 }
0x1ba7   :  { %1184 = vrot.lane.b32.xlu0 %v1182_v28, %s1621_s28 }
0x1bac   :  { %v671_v29 = vpop.permute.xlu1 %670 }
0x1bad   :  { %v1997_v45 = vmul.f32 %v671_v29, %v656_v43 }
0x1baf   :  { %v674_v31 = vpack.c.bf16 %v1997_v45, %v1997_v45  ;;  %607 = vrot.lane.b32.xlu0 %v1892_v57, %s1621_s28 }
0x1bb1   :  { %676 = vrot.lane.b32.xlu1 %v674_v31, %s1621_s28 }
0x1c19   :  { %v1185_v34 = vpop.permute.xlu0 %1184 }
0x1c1a   :  { %v1187_v35 = vadd.f32 %v1185_v34, %v1177_v33 }
0x1c1c   :  { %1602 = vtanh.f32 %v1187_v35 }
0x1c21   :  { %v608_v36 = vpop.permute.xlu0 %607 }
0x1c22   :  { %v1603_v54 = vpop.eup %1602  ;;  %611 = vst.msk [vmem:[#allocation2 + $0x18] sm:$0xf] %vm196_vm15, %v608_v36 }
0x1c23   :  { %1190 = vrot.lane.b32.xlu2 %v1603_v54, %s1620_s27  ;;  %v677_v44 = vpop.permute.xlu1 %676 }
0x1c24   :  { %680 = vst.msk [vmem:[#allocation2 + $0x1c] sm:$0xf] %vm196_vm15, %v677_v44 }
0x1c2b   :  { %v1499_v37 = vld [vmem:[#allocation2 + $0x18] sm:$0xff] }
0x1c2c   :  { %1458 = vmatmul.msk.bf16.gmra.mxu3 %vm134_vm8, %v1499_v37 }
0x1c7d   :  { %v1191_v19 = vpop.permute.xlu2 %1190 }
0x1c7e   :  { %v1193_v57 = vmul.f32 %v1191_v19, %v1176_v25 }
0x1c80   :  { %v2008_v40 = vpack.c.bf16 %v1193_v57, %v1193_v57 }
0x1c82   :  { %v1201_v3 = vunpack.c.l.b16 %v2008_v40 }
0x1c84   :  { %v1202_v30 = vpack.c.b16 %v1201_v3, %v1201_v3 }
0x1c86   :  { %1203 = vrot.lane.b32.xlu2 %v1202_v30, %s1621_s28 }
0x1caf   :  { %v776_v42 = vpop.f32.mrf.mxu3 }
0x1cb0   :  { %v777_v43 = vadd.f32 %v1874_v62, %v776_v42 }
0x1cb7   :  { %v778_v22 = vpop.f32.mrf.mxu3 }
0x1cb8   :  { %v779_v23 = vadd.f32 %v1874_v62, %v778_v22 }
0x1ce0   :  { %v1204_v41 = vpop.permute.xlu2 %1203 }
0x1ce1   :  { %1478 = vmatmul.msk.bf16.vlgmr.msrb.gmra.mxu1 %vm134_vm8, %v1204_v41 }
0x1d5e   :  { %v1217_v46 = vpop.f32.mrf.mxu1 }
0x1d5f   :  { %v1221_v48 = vadd.f32 %v1217_v46, %v777_v43 }
0x1d61   :  { %v1222_v49 = vmul.f32 %v1221_v48, %v1730_v14 }
0x1d63   :  { %v1479_v50 = vmul.f32 -1.442695, %v1222_v49 }
0x1d65   :  { %1604 = vpow2.f32 %v1479_v50 }
0x1d66   :  { %v1219_v55 = vpop.f32.mrf.mxu1 }
0x1d6b   :  { %v1605_v56 = vpop.eup %1604 }
0x1d6c   :  { %v1226_v39 = vadd.f32 1.0, %v1605_v56 }
0x1d6e   :  { %1606 = vrcp.f32 %v1226_v39  ;;  %v1238_v53 = vand.u32 2147483648, %v1226_v39  ;;  %v1236_v63 = vand.u32 2147483647, %v1226_v39  ;;  %vm1232_vm5 = vweird.f32 %v1226_v39 }
0x1d70   :  { %v1239_v1 = vor.u32 1.1754944e-38, %v1238_v53  ;;  %vm1237_vm7 = vcmp.eq.f32.partialorder %v1236_v63, 8.507059e+37 }
0x1d74   :  { %v1607_v58 = vpop.eup %1606 }
0x1d75   :  { %v1228_v47 = vmul.f32 %v1607_v58, %v1226_v39  ;;  %vm1233_vm4 = vweird.f32 %v1607_v58 }
0x1d76   :  { %vm1234_vm6 = vmor %vm1232_vm5, %vm1233_vm4 }
0x1d77   :  { %v1229_v60 = vsub.f32 1.0, %v1228_v47 }
0x1d79   :  { %v1230_v6 = vmul.f32 %v1607_v58, %v1229_v60 }
0x1d7b   :  { %v1231_v0 = vadd.f32 %v1607_v58, %v1230_v6 }
0x1d7d   :  { %v1235_v9 = vsel %vm1234_vm6, %v1607_v58, %v1231_v0 }
0x1d7e   :  { %v1240_v4 = vsel %vm1237_vm7, %v1239_v1, %v1235_v9 }
0x1d7f   :  { %v1242_v5 = vmul.f32 %v1240_v4, %v1730_v14  ;;  %v1519_v4 = vld [vmem:[%s2096_s8] ss:$0 sm:$0xff] }
0x1d81   :  { %v1243_v7 = vadd.f32 %v1242_v5, %v1735_v32 }
0x1d83   :  { %1246 = vrot.lane.b32.xlu0 %v1243_v7, %s1620_s27  ;;  %v1244_v11 = vmul.f32 %v1243_v7, %v1187_v35 }
0x1df5   :  { %v1247_v8 = vpop.permute.xlu0 %1246 }
0x1df6   :  { %v1249_v10 = vmul.f32 %v1247_v8, %v1243_v7 }
0x1df8   :  { %1251 = vrot.lane.b32.xlu1 %v1249_v10, %s1621_s28 }
0x1e6a   :  { %v1252_v12 = vpop.permute.xlu1 %1251 }
0x1e6b   :  { %v1254_v13 = vadd.f32 %v1252_v12, %v1244_v11 }
0x1e6d   :  { %1608 = vtanh.f32 %v1254_v13 }
0x1e73   :  { %v1609_v15 = vpop.eup %1608 }
0x1e74   :  { %1257 = vrot.lane.b32.xlu2 %v1609_v15, %s1620_s27 }
0x1ece   :  { %v1258_v16 = vpop.permute.xlu2 %1257 }
0x1ecf   :  { %v1260_v51 = vmul.f32 %v1258_v16, %v1243_v7 }
0x1ed1   :  { %v2020_v52 = vpack.c.bf16 %v1260_v51, %v1260_v51 }
0x1ed3   :  { %v1268_v18 = vunpack.c.l.b16 %v2020_v52 }
0x1ed5   :  { %v1269_v20 = vpack.c.b16 %v1268_v18, %v1268_v18 }
0x1ed7   :  { %1270 = vrot.lane.b32.xlu0 %v1269_v20, %s1621_s28 }
0x1f49   :  { %v1271_v21 = vpop.permute.xlu0 %1270 }
0x1f4a   :  { %1480 = vmatmul.msk.bf16.vlgmr.msrb.gmra.mxu2 %vm134_vm8, %v1271_v21 }
0x1fcd   :  { %v1284_v25 = vpop.f32.mrf.mxu2 }
0x1fce   :  { %v1288_v26 = vadd.f32 %v1284_v25, %v779_v23 }
0x1fd0   :  { %v1289_v27 = vmul.f32 %v1288_v26, %v1730_v14 }
0x1fd2   :  { %v1481_v28 = vmul.f32 -1.442695, %v1289_v27 }
0x1fd4   :  { %1610 = vpow2.f32 %v1481_v28 }
0x1fd5   :  { %v1286_v29 = vpop.f32.mrf.mxu2 }
0x1fda   :  { %v1611_v31 = vpop.eup %1610 }
0x1fdb   :  { %v1293_v33 = vadd.f32 1.0, %v1611_v31 }
0x1fdd   :  { %1612 = vrcp.f32 %v1293_v33  ;;  %v1305_v54 = vand.u32 2147483648, %v1293_v33  ;;  %v1303_v37 = vand.u32 2147483647, %v1293_v33  ;;  %vm1299_vm10 = vweird.f32 %v1293_v33 }
0x1fdf   :  { %v1306_v62 = vor.u32 1.1754944e-38, %v1305_v54  ;;  %vm1304_vm12 = vcmp.eq.f32.partialorder %v1303_v37, 8.507059e+37 }
0x1fe3   :  { %v1613_v34 = vpop.eup %1612 }
0x1fe4   :  { %v1295_v35 = vmul.f32 %v1613_v34, %v1293_v33  ;;  %vm1300_vm9 = vweird.f32 %v1613_v34 }
0x1fe5   :  { %vm1301_vm11 = vmor %vm1299_vm10, %vm1300_vm9 }
0x1fe6   :  { %v1296_v36 = vsub.f32 1.0, %v1295_v35 }
0x1fe8   :  { %v1297_v44 = vmul.f32 %v1613_v34, %v1296_v36 }
0x1fea   :  { %v1298_v19 = vadd.f32 %v1613_v34, %v1297_v44 }
0x1fec   :  { %v1302_v57 = vsel %vm1301_vm11, %v1613_v34, %v1298_v19 }
0x1fed   :  { %v1307_v3 = vsel %vm1304_vm12, %v1306_v62, %v1302_v57 }
0x1fee   :  { %v1309_v30 = vmul.f32 %v1307_v3, %v1730_v14 }
0x1ff0   :  { %v1310_v41 = vadd.f32 %v1309_v30, %v1735_v32 }
0x1ff2   :  { %1313 = vrot.lane.b32.xlu1 %v1310_v41, %s1620_s27  ;;  %v1311_v46 = vmul.f32 %v1310_v41, %v1254_v13 }
0x2064   :  { %v1314_v42 = vpop.permute.xlu1 %1313 }
0x2065   :  { %v1316_v43 = vmul.f32 %v1314_v42, %v1310_v41 }
0x2067   :  { %1318 = vrot.lane.b32.xlu2 %v1316_v43, %s1621_s28 }
0x20c1   :  { %v1319_v48 = vpop.permute.xlu2 %1318 }
0x20c2   :  { %v1321_v49 = vadd.f32 %v1319_v48, %v1311_v46 }
0x20c4   :  { %1614 = vtanh.f32 %v1321_v49 }
0x20ca   :  { %v1615_v50 = vpop.eup %1614 }
0x20cb   :  { %1324 = vrot.lane.b32.xlu0 %v1615_v50, %s1620_s27 }
0x20d3   :  { %688 = vrot.lane.b32.xlu0 %v1990_v24, %s1622_s3 }
0x20db   :  { %995 = vrot.lane.b32.xlu0 %v1936_v17, %s1621_s28 }
0x20e3   :  { %1196 = vrot.lane.b32.xlu0 %v2008_v40, %s1621_s28 }
0x20eb   :  { %1342 = vrot.lane.b32.xlu0 %v1321_v49, %s1622_s3 }
0x213d   :  { %v1325_v14 = vpop.permute.xlu0 %1324 }
0x213e   :  { %v1327_v32 = vmul.f32 %v1325_v14, %v1310_v41 }
0x2140   :  { %v1328_v55 = vpack.c.bf16 %v1327_v32, %v1327_v32  ;;  %v1512_v58 = vpack.i.bf16 %v1327_v32, %v1997_v45 }
0x2142   :  { %v1355_v56 = vunpack.c.l.b16 %v1328_v55  ;;  %1513 = vrot.lane.b32.xlu2 %v1512_v58, %s1621_s28 }
0x2144   :  { %v1356_v39 = vpack.c.b16 %v1355_v56, %v1355_v56 }
0x2145   :  { %v689_v47 = vpop.permute.xlu0 %688 }
0x2146   :  { %691 = vst.msk [vmem:[%s2095_s11] sm:$0xff] %vm134_vm8, %v689_v47  ;;  %1357 = vrot.lane.b32.xlu1 %v1356_v39, %s1621_s28 }
0x214a   :  { %928 = vrot.lane.b32.xlu2 %v1922_v38, %s1621_s28  ;;  %v1504_v38 = vld [vmem:[%s2097_s7] sm:$0xff] }
0x214d   :  { %v996_v17 = vpop.permute.xlu0 %995 }
0x214e   :  { %998 = vst.msk [vmem:[#allocation2 + $0x8] sm:$0xf] %vm196_vm15, %v996_v17  ;;  %861 = vrot.lane.b32.xlu1 %v1896_v61, %s1621_s28  ;;  %v1505_v61 = vld [vmem:[%s2097_s7 + $0x8] sm:$0xff] }
0x214f   :  { %1380 = vmatpush.bf16.msrb.mxu0 %v1505_v61 }
0x2152   :  { %1129 = vrot.lane.b32.xlu2 %v1980_v2, %s1621_s28 }
0x2153   :  { %1381 = vmatpush.bf16.msrb.mxu0 %v1504_v38 }
0x2155   :  { %v1197_v24 = vpop.permute.xlu0 %1196 }
0x2156   :  { %1199 = vst.msk [vmem:[#allocation2 + $0x14] sm:$0xf] %vm196_vm15, %v1197_v24  ;;  %1062 = vrot.lane.b32.xlu1 %v1958_v59, %s1621_s28 }
0x215a   :  { %1330 = vrot.lane.b32.xlu2 %v1328_v55, %s1621_s28 }
0x215d   :  { %v1343_v45 = vpop.permute.xlu0 %1342 }
0x215e   :  { %1483 = vst.msk [vmem:[%s2095_s11 + $0x8] sm:$0xff] %vm134_vm8, %v1343_v45  ;;  %1263 = vrot.lane.b32.xlu1 %v2020_v52, %s1621_s28 }
0x219c   :  { %v1514_v59 = vpop.permute.xlu2 %1513 }
0x219d   :  { %v1516_v2 = vunpack.i.h.bf16 %v1514_v59  ;;  %v1515_v40 = vunpack.i.l.bf16 %v1514_v59 }
0x219f   :  { %1482 = vst.msk [vmem:[%s2098_s10 + $0x8] sm:$0xff] %vm134_vm8, %v1516_v2 }
0x21a0   :  { %686 = vst.msk [vmem:[%s2098_s10] sm:$0xff] %vm134_vm8, %v1515_v40 }
0x21a4   :  { %v929_v60 = vpop.permute.xlu2 %928 }
0x21a5   :  { %931 = vst.msk [vmem:[#allocation2 + $0x4] sm:$0xf] %vm196_vm15, %v929_v60 }
0x21ac   :  { %v1130_v53 = vpop.permute.xlu2 %1129 }
0x21ad   :  { %1132 = vst.msk [vmem:[#allocation2 + $0x10] sm:$0xf] %vm196_vm15, %v1130_v53 }
0x21b4   :  { %v1331_v63 = vpop.permute.xlu2 %1330 }
0x21b5   :  { %1333 = vst.msk [vmem:[#allocation2 + $0x1c] sm:$0xf] %vm196_vm15, %v1331_v63 }
0x21b8   :  { %v1358_v6 = vpop.permute.xlu1 %1357 }
0x21b9   :  { %1492 = vmatmul.msk.bf16.vlgmr.msrb.gmra.mxu0 %vm134_vm8, %v1358_v6 }
0x21c0   :  { %v862_v0 = vpop.permute.xlu1 %861 }
0x21c1   :  { %864 = vst.msk [vmem:[#allocation2] sm:$0xf] %vm196_vm15, %v862_v0 }
0x21c8   :  { %v1063_v1 = vpop.permute.xlu1 %1062 }
0x21c9   :  { %1065 = vst.msk [vmem:[#allocation2 + $0xc] sm:$0xf] %vm196_vm15, %v1063_v1 }
0x21d0   :  { %v1264_v9 = vpop.permute.xlu1 %1263 }
0x21d1   :  { %1266 = vst.msk [vmem:[#allocation2 + $0x18] sm:$0xf] %vm196_vm15, %v1264_v9 }
0x2236   :  { %v1383_v5 = vpop.f32.mrf.mxu0 }
0x2237   :  { %v1384_v7 = vadd.f32 %v1519_v4, %v1383_v5 }
0x2239   :  { %1387 = vst [vmem:[%s2099_s9] sm:$0xff] %v1384_v7 }
0x223e   :  { %v1385_v8 = vpop.f32.mrf.mxu0 }

</bundles_post_ra>
